<compile_context>
chip_gen: v6e
topology: v6e:2x2x1
jax: 0.10.0
libtpu: 0.0.40
codegen_flags: <defaults>
</compile_context>

<pallas_src>
import functools
import math

import jax
import jax.numpy as jnp
import numpy as np
from jax.experimental import pallas as pl
from jax.experimental.pallas import tpu as pltpu


def _rvq_kernel(x_ref, win_ref, bin_ref, emb2_ref, esq_ref, dec_ref, bout_ref,
                quant_ref, codes_ref, err_ref, *, n_q, mxu_dtype):
    r = x_ref[...].astype(jnp.float32)                       # (D, tile_t) residual (register)
    acc = jnp.zeros_like(r)                                  # quantized accumulator (register)
    nbins = emb2_ref.shape[1]
    tile_t = r.shape[1]
    row = jax.lax.broadcasted_iota(jnp.int32, (nbins, tile_t), 0)
    std = (((1,), (0,)), ((), ()))                           # standard (lhs dim1 x rhs dim0)

    code_rows = []
    err_rows = []
    for q in range(n_q):                                     # static unroll: n_q is small (<=8)
        # project_in
        z = jax.lax.dot_general(win_ref[q], r.astype(mxu_dtype), std,
                                preferred_element_type=jnp.float32) + bin_ref[q]      # (Cd, tile_t)
        # nearest code: argmax (2 e.z - ||e||^2); emb2 = 2*embed precomputed host-side
        dist = jax.lax.dot_general(emb2_ref[q], z.astype(mxu_dtype), std,
                                   preferred_element_type=jnp.float32) - esq_ref[q]   # (bins, tile_t)
        m = jnp.max(dist, axis=0, keepdims=True)                                      # (1, tile_t)
        idx = jnp.min(jnp.where(dist == m, row, nbins), axis=0, keepdims=True)        # (1, tile_t) i32
        onehot = (row == idx).astype(mxu_dtype)                                       # (bins, tile_t)
        # fused dequantize + project_out: decode[q] = W_out[q]^T @ embed[q]^T  (D, bins)
        qout = jax.lax.dot_general(dec_ref[q], onehot, std,
                                   preferred_element_type=jnp.float32) + bout_ref[q]  # (D, tile_t)
        r = r - qout
        acc = acc + qout
        code_rows.append(idx)
        # ||z - e_idx||^2 per token == ||z||^2 - max(dist)
        err_rows.append(jnp.sum(z * z, axis=0, keepdims=True) - m)                    # (1, tile_t)

    quant_ref[...] = acc                                                              # one store
    codes_ref[...] = jnp.concatenate(code_rows, axis=0)                               # (n_q, tile_t)
    err_mat = jnp.concatenate(err_rows, axis=0)                                       # (n_q, tile_t)
    err_ref[...] = jnp.sum(err_mat, axis=1, keepdims=True)                            # (n_q, 1)


def _bw_per_q(bins, sample_rate):
    return math.log2(bins) * sample_rate / 1000


def _num_quantizers(n_q_total, bins, sample_rate, bandwidth):
    n_q = n_q_total
    if bandwidth is not None and bandwidth > 0.0:
        n_q = int(max(1, math.floor(bandwidth / _bw_per_q(bins, sample_rate))))
        n_q = min(n_q, n_q_total)
    return n_q


def _choose_tile_t(T, max_tile=2048):
    if T <= max_tile:
        return T                              # full-T block always satisfies the (8,128) rule
    start = max_tile - (max_tile % 128)
    for cand in range(start, 0, -128):
        if T % cand == 0:
            return cand
    # TODO(synk): ragged time tails would need a pl.cdiv grid plus masking of tail tokens (and
    # excluding them from the commit-loss divisor); not needed for this synthetic driver.
    raise ValueError(f"T={T} has no 128-multiple tile <= {max_tile}; pad T or add tail masking")


def residual_vq_forward(x, params, sample_rate, bandwidth=None, max_tile_t=2048,
                        mxu_dtype=jnp.float32):
    """Fused Pallas RVQ forward.

    Returns (quantized (B,D,T), codes (n_q,B,T) int32, bandwidth scalar, penalty scalar),
    mirroring espnet2 ResidualVectorQuantizer.forward (quantizer_dropout=False).
    mxu_dtype=jnp.bfloat16 casts the MXU-side parameters once on the host (small numeric drift).
    """
    W_in, b_in, embed, W_out, b_out = (params[k] for k in
                                       ("W_in", "b_in", "embed", "W_out", "b_out"))
    n_q_total, bins, Cd = embed.shape
    B, D, T = x.shape
    n_q = _num_quantizers(n_q_total, bins, sample_rate, bandwidth)
    W_in, b_in, embed, W_out, b_out = (a[:n_q] for a in (W_in, b_in, embed, W_out, b_out))

    # One-time host-side parameter prep into kernel-friendly orientations (resident in VMEM).
    embed_f32 = embed.astype(jnp.float32)
    W_in_T = jnp.transpose(W_in, (0, 2, 1)).astype(mxu_dtype)            # (n_q, Cd, D)   MXU lhs
    b_in_T = jnp.transpose(b_in, (0, 2, 1)).astype(jnp.float32)          # (n_q, Cd, 1)
    emb2 = (2.0 * embed_f32).astype(mxu_dtype)                           # (n_q, bins, Cd) MXU lhs
    e_sq = jnp.sum(embed_f32 * embed_f32, axis=-1, keepdims=True)        # (n_q, bins, 1)
    decode = jnp.einsum("qcd,qbc->qdb", W_out.astype(jnp.float32),
                        embed_f32).astype(mxu_dtype)                     # (n_q, D, bins) MXU lhs
    b_out_T = jnp.transpose(b_out, (0, 2, 1)).astype(jnp.float32)        # (n_q, D, 1)

    tile_t = _choose_tile_t(T, max_tile_t)
    num_t_tiles = T // tile_t
    x_f32 = x.astype(jnp.float32)

    # Modest explicit VMEM budget (true working set is tiny; never request a full v7x TC).
    itemsize = jnp.dtype(mxu_dtype).itemsize
    param_bytes = (int(np.prod(W_in_T.shape)) + int(np.prod(emb2.shape))
                   + int(np.prod(decode.shape))) * itemsize \
                  + 4 * (int(np.prod(b_in_T.shape)) + int(np.prod(e_sq.shape))
                         + int(np.prod(b_out_T.shape)))
    tile_bytes = 4 * tile_t * (2 * D + n_q) + 4 * n_q            # x + quant + codes + err blocks
    interm_bytes = 4 * tile_t * (2 * bins + 2 * Cd + 3 * D)      # dist/onehot/z/r/acc/qout
    est_bytes = param_bytes + 2 * tile_bytes + interm_bytes
    vmem_limit = int(min(max(6 * est_bytes, 8 * 2 ** 20), 32 * 2 ** 20))

    flops = 2 * B * T * n_q * (D * Cd + Cd * bins + D * bins)
    bytes_accessed = 4 * (2 * B * D * T + B * n_q * T) + param_bytes
    cost = pl.CostEstimate(flops=int(flops), transcendentals=0, bytes_accessed=int(bytes_accessed))

    grid_spec = pltpu.PrefetchScalarGridSpec(
        num_scalar_prefetch=0,
        grid=(B, num_t_tiles),                                            # q loop is in-kernel
        in_specs=[
            pl.BlockSpec((None, D, tile_t), lambda b, i: (b, 0, i)),      # x tile (streamed)
            pl.BlockSpec((n_q, Cd, D), lambda b, i: (0, 0, 0)),           # W_in^T    (resident)
            pl.BlockSpec((n_q, Cd, 1), lambda b, i: (0, 0, 0)),           # b_in      (resident)
            pl.BlockSpec((n_q, bins, Cd), lambda b, i: (0, 0, 0)),        # 2*embed   (resident)
            pl.BlockSpec((n_q, bins, 1), lambda b, i: (0, 0, 0)),         # ||e||^2   (resident)
            pl.BlockSpec((n_q, D, bins), lambda b, i: (0, 0, 0)),         # decode    (resident)
            pl.BlockSpec((n_q, D, 1), lambda b, i: (0, 0, 0)),            # b_out     (resident)
        ],
        out_specs=[
            pl.BlockSpec((None, D, tile_t), lambda b, i: (b, 0, i)),      # quantized
            pl.BlockSpec((None, n_q, tile_t), lambda b, i: (b, 0, i)),    # codes  (B, n_q, T)
            pl.BlockSpec((None, None, n_q, 1), lambda b, i: (b, i, 0, 0)),  # err partial sums
        ],
    )

    quant, codes_bqt, err_part = pl.pallas_call(
        functools.partial(_rvq_kernel, n_q=n_q, mxu_dtype=mxu_dtype),
        out_shape=(
            jax.ShapeDtypeStruct((B, D, T), jnp.float32),
            jax.ShapeDtypeStruct((B, n_q, T), jnp.int32),
            jax.ShapeDtypeStruct((B, num_t_tiles, n_q, 1), jnp.float32),
        ),
        grid_spec=grid_spec,
        compiler_params=pltpu.CompilerParams(
            dimension_semantics=("parallel", "parallel"),
            vmem_limit_bytes=vmem_limit),
        cost_estimate=cost,
    )(x_f32, W_in_T, b_in_T, emb2, e_sq, decode, b_out_T)

    quantized = quant.astype(x.dtype)                                # already (B, D, T)
    codes = jnp.transpose(codes_bqt, (1, 0, 2))                      # (n_q, B, T), tiny int array
    commit_loss = err_part.sum(axis=(0, 1, 3)) / (B * T * Cd)        # per-layer mean((zq - z)^2)
    penalty = commit_loss.mean()
    bw = jnp.asarray(n_q * _bw_per_q(bins, sample_rate), dtype=x.dtype)
    return quantized, codes, bw, penalty


def residual_vq_ref(x, params, sample_rate, bandwidth=None):
    """Plain-JAX reference mirroring the PyTorch forward (for correctness check)."""
    W_in, b_in, embed, W_out, b_out = (params[k] for k in
                                       ("W_in", "b_in", "embed", "W_out", "b_out"))
    n_q_total, bins, Cd = embed.shape
    B, D, T = x.shape
    n_q = _num_quantizers(n_q_total, bins, sample_rate, bandwidth)
    residual = jnp.transpose(x, (0, 2, 1)).astype(jnp.float32)              # (B,T,D)
    quantized_out = jnp.zeros_like(residual)
    codes, losses = [], []
    for q in range(n_q):
        z = residual @ W_in[q] + b_in[q]                                    # (B,T,Cd)
        e = embed[q]
        d2 = ((z[..., None, :] - e[None, None]) ** 2).sum(-1)               # (B,T,bins)
        idx = jnp.argmin(d2, axis=-1)
        zq = e[idx]
        qout = zq @ W_out[q] + b_out[q]
        residual = residual - qout
        quantized_out = quantized_out + qout
        codes.append(idx.astype(jnp.int32))
        losses.append(jnp.mean((zq - z) ** 2))
    quantized = jnp.transpose(quantized_out, (0, 2, 1)).astype(x.dtype)
    bw = jnp.asarray(n_q * _bw_per_q(bins, sample_rate), x.dtype)
    return quantized, jnp.stack(codes), bw, jnp.mean(jnp.stack(losses))


def make_params(key, n_q, dim, codebook_dim, bins):
    # Deterministic synthetic parameters.
    # TODO(synk): kmeans_init + EMA codebook updates / dead-code expiration are training-time
    # state of the PyTorch module and are not reproduced in this eval-style forward.
    ks = jax.random.split(key, 5)
    return {
        "W_in": (jax.random.normal(ks[0], (n_q, dim, codebook_dim), jnp.float32)
                 / math.sqrt(dim)),
        "b_in": 0.01 * jax.random.normal(ks[1], (n_q, 1, codebook_dim), jnp.float32),
        "embed": jax.random.normal(ks[2], (n_q, bins, codebook_dim), jnp.float32),
        "W_out": (jax.random.normal(ks[3], (n_q, codebook_dim, dim), jnp.float32)
                  / math.sqrt(codebook_dim)),
        "b_out": 0.01 * jax.random.normal(ks[4], (n_q, 1, dim), jnp.float32),
    }


if __name__ == "__main__":
    # Small shapes consistent with the module: dimension=8, codebook_dim=16, n_q=4, bins=64.
    # T=128 keeps every output store lane-dense (128-wide) even at this small size.
    B, D, T = 2, 8, 128
    n_q, Cd, bins = 4, 16, 64
    sample_rate = 16000

    key = jax.random.PRNGKey(0)
    kp, kx = jax.random.split(key)
    params = make_params(kp, n_q, D, Cd, bins)
    x = jax.random.normal(kx, (B, D, T), jnp.float32)

    # 1) fp32 MXU path: code parity with the fp32 reference.
    quantized, codes, bw, penalty = residual_vq_forward(x, params, sample_rate, bandwidth=None)
    jax.block_until_ready((quantized, codes, bw, penalty))

    q_ref, c_ref, bw_ref, p_ref = residual_vq_ref(x, params, sample_rate, bandwidth=None)
    assert quantized.shape == (B, D, T) and codes.shape == (n_q, B, T)
    np.testing.assert_array_equal(np.asarray(codes), np.asarray(c_ref))
    np.testing.assert_allclose(np.asarray(quantized), np.asarray(q_ref), rtol=1e-4, atol=1e-4)
    np.testing.assert_allclose(float(bw), float(bw_ref), rtol=1e-6)
    np.testing.assert_allclose(float(penalty), float(p_ref), rtol=1e-4, atol=1e-4)

    # 2) bandwidth-limited path (n_q derived from target bandwidth -> 2 quantizers here).
    target_bw = 2.5 * _bw_per_q(bins, sample_rate)
    q2, c2, bw2, p2 = residual_vq_forward(x, params, sample_rate, bandwidth=target_bw)
    jax.block_until_ready((q2, c2, p2))
    q2_ref, c2_ref, bw2_ref, p2_ref = residual_vq_ref(x, params, sample_rate, bandwidth=target_bw)
    assert c2.shape == (2, B, T)
    np.testing.assert_array_equal(np.asarray(c2), np.asarray(c2_ref))
    np.testing.assert_allclose(np.asarray(q2), np.asarray(q2_ref), rtol=1e-4, atol=1e-4)
    np.testing.assert_allclose(float(bw2), float(bw2_ref), rtol=1e-6)
    np.testing.assert_allclose(float(p2), float(p2_ref), rtol=1e-4, atol=1e-4)

    # 3) bf16 MXU-operand path (perf option): smoke test only (tiny drift vs fp32 reference).
    qb, cb, _, pb = residual_vq_forward(x, params, sample_rate, mxu_dtype=jnp.bfloat16)
    jax.block_until_ready((qb, cb, pb))
    assert qb.shape == (B, D, T) and cb.shape == (n_q, B, T)
    assert bool(jnp.all(jnp.isfinite(qb)))
    assert bool(jnp.all((cb >= 0) & (cb < bins)))
    assert bool(jnp.isfinite(pb))

    print("KERNEL_OK")
</pallas_src>

<mosaic_0001>
module attributes {stable_mosaic.version = 11 : i64} {
  func.func @_rvq_kernel(%arg0: i32, %arg1: i32, %arg2: memref<1x8x128xf32, #tpu.memory_space<vmem>>, %arg3: memref<4x16x8xf32, #tpu.memory_space<vmem>>, %arg4: memref<4x16x1xf32, #tpu.memory_space<vmem>>, %arg5: memref<4x64x16xf32, #tpu.memory_space<vmem>>, %arg6: memref<4x64x1xf32, #tpu.memory_space<vmem>>, %arg7: memref<4x8x64xf32, #tpu.memory_space<vmem>>, %arg8: memref<4x8x1xf32, #tpu.memory_space<vmem>>, %arg9: memref<1x8x128xf32, #tpu.memory_space<vmem>>, %arg10: memref<1x4x128xi32, #tpu.memory_space<vmem>>, %arg11: memref<1x1x4x1xf32, #tpu.memory_space<vmem>>) attributes {dimension_semantics = [#tpu.dimension_semantics<parallel>, #tpu.dimension_semantics<parallel>], iteration_bounds = array<i64: 2, 1>, scalar_prefetch = 0 : i64, scratch_operands = 0 : i64, tpu.core_type = #tpu.core_type<tc>, window_params = [{transform_indices = @transform_0, window_bounds = array<i64: 1, 8, 128>}, {pipeline_mode = #tpu.pipeline_mode<synchronous>, transform_indices = @transform_1, window_bounds = array<i64: 4, 16, 8>}, {pipeline_mode = #tpu.pipeline_mode<synchronous>, transform_indices = @transform_2, window_bounds = array<i64: 4, 16, 1>}, {pipeline_mode = #tpu.pipeline_mode<synchronous>, transform_indices = @transform_3, window_bounds = array<i64: 4, 64, 16>}, {pipeline_mode = #tpu.pipeline_mode<synchronous>, transform_indices = @transform_4, window_bounds = array<i64: 4, 64, 1>}, {pipeline_mode = #tpu.pipeline_mode<synchronous>, transform_indices = @transform_5, window_bounds = array<i64: 4, 8, 64>}, {pipeline_mode = #tpu.pipeline_mode<synchronous>, transform_indices = @transform_6, window_bounds = array<i64: 4, 8, 1>}, {transform_indices = @transform_7, window_bounds = array<i64: 1, 8, 128>}, {transform_indices = @transform_8, window_bounds = array<i64: 1, 4, 128>}, {transform_indices = @transform_9, window_bounds = array<i64: 1, 1, 4, 1>}]} {
    %c0 = arith.constant 0 : index
    %c0_0 = arith.constant 0 : index
    %c0_1 = arith.constant 0 : index
    %0 = vector.load %arg2[%c0, %c0_0, %c0_1] : memref<1x8x128xf32, #tpu.memory_space<vmem>>, vector<1x8x128xf32>
    %1 = vector.shape_cast %0 : vector<1x8x128xf32> to vector<8x128xf32>
    %cst = arith.constant 0.000000e+00 : f32
    %2 = vector.broadcast %cst : f32 to vector<8x128xf32>
    %3 = tpu.iota {dimensions = array<i32: 0>} : vector<64x128xi32>
    %c0_2 = arith.constant 0 : index
    %c0_3 = arith.constant 0 : index
    %c0_4 = arith.constant 0 : index
    %4 = vector.load %arg3[%c0_2, %c0_3, %c0_4] : memref<4x16x8xf32, #tpu.memory_space<vmem>>, vector<1x16x8xf32>
    %5 = vector.shape_cast %4 : vector<1x16x8xf32> to vector<16x8xf32>
    %cst_5 = arith.constant dense<0.000000e+00> : vector<16x128xf32>
    %6 = tpu.matmul %5, %1, %cst_5 {dimension_numbers = #tpu.dot_dimension_numbers<[1], [0], [0], [1], [0, 0, 1, 1], [], []>} : vector<16x8xf32>, vector<8x128xf32>, vector<16x128xf32> -> vector<16x128xf32>
    %c0_6 = arith.constant 0 : index
    %c0_7 = arith.constant 0 : index
    %c0_8 = arith.constant 0 : index
    %7 = vector.load %arg4[%c0_6, %c0_7, %c0_8] : memref<4x16x1xf32, #tpu.memory_space<vmem>>, vector<1x16x1xf32>
    %8 = vector.shape_cast %7 : vector<1x16x1xf32> to vector<16x1xf32>
    %9 = vector.broadcast %8 : vector<16x1xf32> to vector<16x128xf32>
    %10 = arith.addf %6, %9 : vector<16x128xf32>
    %c0_9 = arith.constant 0 : index
    %c0_10 = arith.constant 0 : index
    %c0_11 = arith.constant 0 : index
    %11 = vector.load %arg5[%c0_9, %c0_10, %c0_11] : memref<4x64x16xf32, #tpu.memory_space<vmem>>, vector<1x64x16xf32>
    %12 = vector.shape_cast %11 : vector<1x64x16xf32> to vector<64x16xf32>
    %cst_12 = arith.constant dense<0.000000e+00> : vector<64x128xf32>
    %13 = tpu.matmul %12, %10, %cst_12 {dimension_numbers = #tpu.dot_dimension_numbers<[1], [0], [0], [1], [0, 0, 1, 1], [], []>} : vector<64x16xf32>, vector<16x128xf32>, vector<64x128xf32> -> vector<64x128xf32>
    %c0_13 = arith.constant 0 : index
    %c0_14 = arith.constant 0 : index
    %c0_15 = arith.constant 0 : index
    %14 = vector.load %arg6[%c0_13, %c0_14, %c0_15] : memref<4x64x1xf32, #tpu.memory_space<vmem>>, vector<1x64x1xf32>
    %15 = vector.shape_cast %14 : vector<1x64x1xf32> to vector<64x1xf32>
    %16 = vector.broadcast %15 : vector<64x1xf32> to vector<64x128xf32>
    %17 = arith.subf %13, %16 : vector<64x128xf32>
    %cst_16 = arith.constant dense<0xFF800000> : vector<128xf32>
    %18 = vector.multi_reduction <maximumf>, %17, %cst_16 [0] : vector<64x128xf32> to vector<128xf32>
    %19 = vector.shape_cast %18 : vector<128xf32> to vector<1x128xf32>
    %20 = vector.broadcast %19 : vector<1x128xf32> to vector<64x128xf32>
    %21 = arith.cmpf oeq, %17, %20 : vector<64x128xf32>
    %c64_i32 = arith.constant 64 : i32
    %22 = vector.broadcast %c64_i32 : i32 to vector<64x128xi32>
    %23 = arith.select %21, %3, %22 : vector<64x128xi1>, vector<64x128xi32>
    %cst_17 = arith.constant dense<2147483647> : vector<128xi32>
    %24 = vector.multi_reduction <minsi>, %23, %cst_17 [0] : vector<64x128xi32> to vector<128xi32>
    %25 = vector.shape_cast %24 : vector<128xi32> to vector<1x128xi32>
    %26 = vector.broadcast %25 : vector<1x128xi32> to vector<64x128xi32>
    %27 = arith.cmpi eq, %3, %26 : vector<64x128xi32>
    %28 = arith.extui %27 : vector<64x128xi1> to vector<64x128xi32>
    %29 = arith.sitofp %28 : vector<64x128xi32> to vector<64x128xf32>
    %c0_18 = arith.constant 0 : index
    %c0_19 = arith.constant 0 : index
    %c0_20 = arith.constant 0 : index
    %30 = vector.load %arg7[%c0_18, %c0_19, %c0_20] : memref<4x8x64xf32, #tpu.memory_space<vmem>>, vector<1x8x64xf32>
    %31 = vector.shape_cast %30 : vector<1x8x64xf32> to vector<8x64xf32>
    %cst_21 = arith.constant dense<0.000000e+00> : vector<8x128xf32>
    %32 = tpu.matmul %31, %29, %cst_21 {dimension_numbers = #tpu.dot_dimension_numbers<[1], [0], [0], [1], [0, 0, 1, 1], [], []>} : vector<8x64xf32>, vector<64x128xf32>, vector<8x128xf32> -> vector<8x128xf32>
    %c0_22 = arith.constant 0 : index
    %c0_23 = arith.constant 0 : index
    %c0_24 = arith.constant 0 : index
    %33 = vector.load %arg8[%c0_22, %c0_23, %c0_24] : memref<4x8x1xf32, #tpu.memory_space<vmem>>, vector<1x8x1xf32>
    %34 = vector.shape_cast %33 : vector<1x8x1xf32> to vector<8x1xf32>
    %35 = vector.broadcast %34 : vector<8x1xf32> to vector<8x128xf32>
    %36 = arith.addf %32, %35 : vector<8x128xf32>
    %37 = arith.subf %1, %36 : vector<8x128xf32>
    %38 = arith.addf %2, %36 : vector<8x128xf32>
    %39 = arith.mulf %10, %10 : vector<16x128xf32>
    %cst_25 = arith.constant dense<0.000000e+00> : vector<128xf32>
    %40 = vector.multi_reduction <add>, %39, %cst_25 [0] : vector<16x128xf32> to vector<128xf32>
    %41 = vector.shape_cast %40 : vector<128xf32> to vector<1x128xf32>
    %42 = arith.subf %41, %19 : vector<1x128xf32>
    %c1 = arith.constant 1 : index
    %c0_26 = arith.constant 0 : index
    %c0_27 = arith.constant 0 : index
    %43 = vector.load %arg3[%c1, %c0_26, %c0_27] : memref<4x16x8xf32, #tpu.memory_space<vmem>>, vector<1x16x8xf32>
    %44 = vector.shape_cast %43 : vector<1x16x8xf32> to vector<16x8xf32>
    %cst_28 = arith.constant dense<0.000000e+00> : vector<16x128xf32>
    %45 = tpu.matmul %44, %37, %cst_28 {dimension_numbers = #tpu.dot_dimension_numbers<[1], [0], [0], [1], [0, 0, 1, 1], [], []>} : vector<16x8xf32>, vector<8x128xf32>, vector<16x128xf32> -> vector<16x128xf32>
    %c1_29 = arith.constant 1 : index
    %c0_30 = arith.constant 0 : index
    %c0_31 = arith.constant 0 : index
    %46 = vector.load %arg4[%c1_29, %c0_30, %c0_31] : memref<4x16x1xf32, #tpu.memory_space<vmem>>, vector<1x16x1xf32>
    %47 = vector.shape_cast %46 : vector<1x16x1xf32> to vector<16x1xf32>
    %48 = vector.broadcast %47 : vector<16x1xf32> to vector<16x128xf32>
    %49 = arith.addf %45, %48 : vector<16x128xf32>
    %c1_32 = arith.constant 1 : index
    %c0_33 = arith.constant 0 : index
    %c0_34 = arith.constant 0 : index
    %50 = vector.load %arg5[%c1_32, %c0_33, %c0_34] : memref<4x64x16xf32, #tpu.memory_space<vmem>>, vector<1x64x16xf32>
    %51 = vector.shape_cast %50 : vector<1x64x16xf32> to vector<64x16xf32>
    %cst_35 = arith.constant dense<0.000000e+00> : vector<64x128xf32>
    %52 = tpu.matmul %51, %49, %cst_35 {dimension_numbers = #tpu.dot_dimension_numbers<[1], [0], [0], [1], [0, 0, 1, 1], [], []>} : vector<64x16xf32>, vector<16x128xf32>, vector<64x128xf32> -> vector<64x128xf32>
    %c1_36 = arith.constant 1 : index
    %c0_37 = arith.constant 0 : index
    %c0_38 = arith.constant 0 : index
    %53 = vector.load %arg6[%c1_36, %c0_37, %c0_38] : memref<4x64x1xf32, #tpu.memory_space<vmem>>, vector<1x64x1xf32>
    %54 = vector.shape_cast %53 : vector<1x64x1xf32> to vector<64x1xf32>
    %55 = vector.broadcast %54 : vector<64x1xf32> to vector<64x128xf32>
    %56 = arith.subf %52, %55 : vector<64x128xf32>
    %cst_39 = arith.constant dense<0xFF800000> : vector<128xf32>
    %57 = vector.multi_reduction <maximumf>, %56, %cst_39 [0] : vector<64x128xf32> to vector<128xf32>
    %58 = vector.shape_cast %57 : vector<128xf32> to vector<1x128xf32>
    %59 = vector.broadcast %58 : vector<1x128xf32> to vector<64x128xf32>
    %60 = arith.cmpf oeq, %56, %59 : vector<64x128xf32>
    %c64_i32_40 = arith.constant 64 : i32
    %61 = vector.broadcast %c64_i32_40 : i32 to vector<64x128xi32>
    %62 = arith.select %60, %3, %61 : vector<64x128xi1>, vector<64x128xi32>
    %cst_41 = arith.constant dense<2147483647> : vector<128xi32>
    %63 = vector.multi_reduction <minsi>, %62, %cst_41 [0] : vector<64x128xi32> to vector<128xi32>
    %64 = vector.shape_cast %63 : vector<128xi32> to vector<1x128xi32>
    %65 = vector.broadcast %64 : vector<1x128xi32> to vector<64x128xi32>
    %66 = arith.cmpi eq, %3, %65 : vector<64x128xi32>
    %67 = arith.extui %66 : vector<64x128xi1> to vector<64x128xi32>
    %68 = arith.sitofp %67 : vector<64x128xi32> to vector<64x128xf32>
    %c1_42 = arith.constant 1 : index
    %c0_43 = arith.constant 0 : index
    %c0_44 = arith.constant 0 : index
    %69 = vector.load %arg7[%c1_42, %c0_43, %c0_44] : memref<4x8x64xf32, #tpu.memory_space<vmem>>, vector<1x8x64xf32>
    %70 = vector.shape_cast %69 : vector<1x8x64xf32> to vector<8x64xf32>
    %cst_45 = arith.constant dense<0.000000e+00> : vector<8x128xf32>
    %71 = tpu.matmul %70, %68, %cst_45 {dimension_numbers = #tpu.dot_dimension_numbers<[1], [0], [0], [1], [0, 0, 1, 1], [], []>} : vector<8x64xf32>, vector<64x128xf32>, vector<8x128xf32> -> vector<8x128xf32>
    %c1_46 = arith.constant 1 : index
    %c0_47 = arith.constant 0 : index
    %c0_48 = arith.constant 0 : index
    %72 = vector.load %arg8[%c1_46, %c0_47, %c0_48] : memref<4x8x1xf32, #tpu.memory_space<vmem>>, vector<1x8x1xf32>
    %73 = vector.shape_cast %72 : vector<1x8x1xf32> to vector<8x1xf32>
    %74 = vector.broadcast %73 : vector<8x1xf32> to vector<8x128xf32>
    %75 = arith.addf %71, %74 : vector<8x128xf32>
    %76 = arith.subf %37, %75 : vector<8x128xf32>
    %77 = arith.addf %38, %75 : vector<8x128xf32>
    %78 = arith.mulf %49, %49 : vector<16x128xf32>
    %cst_49 = arith.constant dense<0.000000e+00> : vector<128xf32>
    %79 = vector.multi_reduction <add>, %78, %cst_49 [0] : vector<16x128xf32> to vector<128xf32>
    %80 = vector.shape_cast %79 : vector<128xf32> to vector<1x128xf32>
    %81 = arith.subf %80, %58 : vector<1x128xf32>
    %c2 = arith.constant 2 : index
    %c0_50 = arith.constant 0 : index
    %c0_51 = arith.constant 0 : index
    %82 = vector.load %arg3[%c2, %c0_50, %c0_51] : memref<4x16x8xf32, #tpu.memory_space<vmem>>, vector<1x16x8xf32>
    %83 = vector.shape_cast %82 : vector<1x16x8xf32> to vector<16x8xf32>
    %cst_52 = arith.constant dense<0.000000e+00> : vector<16x128xf32>
    %84 = tpu.matmul %83, %76, %cst_52 {dimension_numbers = #tpu.dot_dimension_numbers<[1], [0], [0], [1], [0, 0, 1, 1], [], []>} : vector<16x8xf32>, vector<8x128xf32>, vector<16x128xf32> -> vector<16x128xf32>
    %c2_53 = arith.constant 2 : index
    %c0_54 = arith.constant 0 : index
    %c0_55 = arith.constant 0 : index
    %85 = vector.load %arg4[%c2_53, %c0_54, %c0_55] : memref<4x16x1xf32, #tpu.memory_space<vmem>>, vector<1x16x1xf32>
    %86 = vector.shape_cast %85 : vector<1x16x1xf32> to vector<16x1xf32>
    %87 = vector.broadcast %86 : vector<16x1xf32> to vector<16x128xf32>
    %88 = arith.addf %84, %87 : vector<16x128xf32>
    %c2_56 = arith.constant 2 : index
    %c0_57 = arith.constant 0 : index
    %c0_58 = arith.constant 0 : index
    %89 = vector.load %arg5[%c2_56, %c0_57, %c0_58] : memref<4x64x16xf32, #tpu.memory_space<vmem>>, vector<1x64x16xf32>
    %90 = vector.shape_cast %89 : vector<1x64x16xf32> to vector<64x16xf32>
    %cst_59 = arith.constant dense<0.000000e+00> : vector<64x128xf32>
    %91 = tpu.matmul %90, %88, %cst_59 {dimension_numbers = #tpu.dot_dimension_numbers<[1], [0], [0], [1], [0, 0, 1, 1], [], []>} : vector<64x16xf32>, vector<16x128xf32>, vector<64x128xf32> -> vector<64x128xf32>
    %c2_60 = arith.constant 2 : index
    %c0_61 = arith.constant 0 : index
    %c0_62 = arith.constant 0 : index
    %92 = vector.load %arg6[%c2_60, %c0_61, %c0_62] : memref<4x64x1xf32, #tpu.memory_space<vmem>>, vector<1x64x1xf32>
    %93 = vector.shape_cast %92 : vector<1x64x1xf32> to vector<64x1xf32>
    %94 = vector.broadcast %93 : vector<64x1xf32> to vector<64x128xf32>
    %95 = arith.subf %91, %94 : vector<64x128xf32>
    %cst_63 = arith.constant dense<0xFF800000> : vector<128xf32>
    %96 = vector.multi_reduction <maximumf>, %95, %cst_63 [0] : vector<64x128xf32> to vector<128xf32>
    %97 = vector.shape_cast %96 : vector<128xf32> to vector<1x128xf32>
    %98 = vector.broadcast %97 : vector<1x128xf32> to vector<64x128xf32>
    %99 = arith.cmpf oeq, %95, %98 : vector<64x128xf32>
    %c64_i32_64 = arith.constant 64 : i32
    %100 = vector.broadcast %c64_i32_64 : i32 to vector<64x128xi32>
    %101 = arith.select %99, %3, %100 : vector<64x128xi1>, vector<64x128xi32>
    %cst_65 = arith.constant dense<2147483647> : vector<128xi32>
    %102 = vector.multi_reduction <minsi>, %101, %cst_65 [0] : vector<64x128xi32> to vector<128xi32>
    %103 = vector.shape_cast %102 : vector<128xi32> to vector<1x128xi32>
    %104 = vector.broadcast %103 : vector<1x128xi32> to vector<64x128xi32>
    %105 = arith.cmpi eq, %3, %104 : vector<64x128xi32>
    %106 = arith.extui %105 : vector<64x128xi1> to vector<64x128xi32>
    %107 = arith.sitofp %106 : vector<64x128xi32> to vector<64x128xf32>
    %c2_66 = arith.constant 2 : index
    %c0_67 = arith.constant 0 : index
    %c0_68 = arith.constant 0 : index
    %108 = vector.load %arg7[%c2_66, %c0_67, %c0_68] : memref<4x8x64xf32, #tpu.memory_space<vmem>>, vector<1x8x64xf32>
    %109 = vector.shape_cast %108 : vector<1x8x64xf32> to vector<8x64xf32>
    %cst_69 = arith.constant dense<0.000000e+00> : vector<8x128xf32>
    %110 = tpu.matmul %109, %107, %cst_69 {dimension_numbers = #tpu.dot_dimension_numbers<[1], [0], [0], [1], [0, 0, 1, 1], [], []>} : vector<8x64xf32>, vector<64x128xf32>, vector<8x128xf32> -> vector<8x128xf32>
    %c2_70 = arith.constant 2 : index
    %c0_71 = arith.constant 0 : index
    %c0_72 = arith.constant 0 : index
    %111 = vector.load %arg8[%c2_70, %c0_71, %c0_72] : memref<4x8x1xf32, #tpu.memory_space<vmem>>, vector<1x8x1xf32>
    %112 = vector.shape_cast %111 : vector<1x8x1xf32> to vector<8x1xf32>
    %113 = vector.broadcast %112 : vector<8x1xf32> to vector<8x128xf32>
    %114 = arith.addf %110, %113 : vector<8x128xf32>
    %115 = arith.subf %76, %114 : vector<8x128xf32>
    %116 = arith.addf %77, %114 : vector<8x128xf32>
    %117 = arith.mulf %88, %88 : vector<16x128xf32>
    %cst_73 = arith.constant dense<0.000000e+00> : vector<128xf32>
    %118 = vector.multi_reduction <add>, %117, %cst_73 [0] : vector<16x128xf32> to vector<128xf32>
    %119 = vector.shape_cast %118 : vector<128xf32> to vector<1x128xf32>
    %120 = arith.subf %119, %97 : vector<1x128xf32>
    %c3 = arith.constant 3 : index
    %c0_74 = arith.constant 0 : index
    %c0_75 = arith.constant 0 : index
    %121 = vector.load %arg3[%c3, %c0_74, %c0_75] : memref<4x16x8xf32, #tpu.memory_space<vmem>>, vector<1x16x8xf32>
    %122 = vector.shape_cast %121 : vector<1x16x8xf32> to vector<16x8xf32>
    %cst_76 = arith.constant dense<0.000000e+00> : vector<16x128xf32>
    %123 = tpu.matmul %122, %115, %cst_76 {dimension_numbers = #tpu.dot_dimension_numbers<[1], [0], [0], [1], [0, 0, 1, 1], [], []>} : vector<16x8xf32>, vector<8x128xf32>, vector<16x128xf32> -> vector<16x128xf32>
    %c3_77 = arith.constant 3 : index
    %c0_78 = arith.constant 0 : index
    %c0_79 = arith.constant 0 : index
    %124 = vector.load %arg4[%c3_77, %c0_78, %c0_79] : memref<4x16x1xf32, #tpu.memory_space<vmem>>, vector<1x16x1xf32>
    %125 = vector.shape_cast %124 : vector<1x16x1xf32> to vector<16x1xf32>
    %126 = vector.broadcast %125 : vector<16x1xf32> to vector<16x128xf32>
    %127 = arith.addf %123, %126 : vector<16x128xf32>
    %c3_80 = arith.constant 3 : index
    %c0_81 = arith.constant 0 : index
    %c0_82 = arith.constant 0 : index
    %128 = vector.load %arg5[%c3_80, %c0_81, %c0_82] : memref<4x64x16xf32, #tpu.memory_space<vmem>>, vector<1x64x16xf32>
    %129 = vector.shape_cast %128 : vector<1x64x16xf32> to vector<64x16xf32>
    %cst_83 = arith.constant dense<0.000000e+00> : vector<64x128xf32>
    %130 = tpu.matmul %129, %127, %cst_83 {dimension_numbers = #tpu.dot_dimension_numbers<[1], [0], [0], [1], [0, 0, 1, 1], [], []>} : vector<64x16xf32>, vector<16x128xf32>, vector<64x128xf32> -> vector<64x128xf32>
    %c3_84 = arith.constant 3 : index
    %c0_85 = arith.constant 0 : index
    %c0_86 = arith.constant 0 : index
    %131 = vector.load %arg6[%c3_84, %c0_85, %c0_86] : memref<4x64x1xf32, #tpu.memory_space<vmem>>, vector<1x64x1xf32>
    %132 = vector.shape_cast %131 : vector<1x64x1xf32> to vector<64x1xf32>
    %133 = vector.broadcast %132 : vector<64x1xf32> to vector<64x128xf32>
    %134 = arith.subf %130, %133 : vector<64x128xf32>
    %cst_87 = arith.constant dense<0xFF800000> : vector<128xf32>
    %135 = vector.multi_reduction <maximumf>, %134, %cst_87 [0] : vector<64x128xf32> to vector<128xf32>
    %136 = vector.shape_cast %135 : vector<128xf32> to vector<1x128xf32>
    %137 = vector.broadcast %136 : vector<1x128xf32> to vector<64x128xf32>
    %138 = arith.cmpf oeq, %134, %137 : vector<64x128xf32>
    %c64_i32_88 = arith.constant 64 : i32
    %139 = vector.broadcast %c64_i32_88 : i32 to vector<64x128xi32>
    %140 = arith.select %138, %3, %139 : vector<64x128xi1>, vector<64x128xi32>
    %cst_89 = arith.constant dense<2147483647> : vector<128xi32>
    %141 = vector.multi_reduction <minsi>, %140, %cst_89 [0] : vector<64x128xi32> to vector<128xi32>
    %142 = vector.shape_cast %141 : vector<128xi32> to vector<1x128xi32>
    %143 = vector.broadcast %142 : vector<1x128xi32> to vector<64x128xi32>
    %144 = arith.cmpi eq, %3, %143 : vector<64x128xi32>
    %145 = arith.extui %144 : vector<64x128xi1> to vector<64x128xi32>
    %146 = arith.sitofp %145 : vector<64x128xi32> to vector<64x128xf32>
    %c3_90 = arith.constant 3 : index
    %c0_91 = arith.constant 0 : index
    %c0_92 = arith.constant 0 : index
    %147 = vector.load %arg7[%c3_90, %c0_91, %c0_92] : memref<4x8x64xf32, #tpu.memory_space<vmem>>, vector<1x8x64xf32>
    %148 = vector.shape_cast %147 : vector<1x8x64xf32> to vector<8x64xf32>
    %cst_93 = arith.constant dense<0.000000e+00> : vector<8x128xf32>
    %149 = tpu.matmul %148, %146, %cst_93 {dimension_numbers = #tpu.dot_dimension_numbers<[1], [0], [0], [1], [0, 0, 1, 1], [], []>} : vector<8x64xf32>, vector<64x128xf32>, vector<8x128xf32> -> vector<8x128xf32>
    %c3_94 = arith.constant 3 : index
    %c0_95 = arith.constant 0 : index
    %c0_96 = arith.constant 0 : index
    %150 = vector.load %arg8[%c3_94, %c0_95, %c0_96] : memref<4x8x1xf32, #tpu.memory_space<vmem>>, vector<1x8x1xf32>
    %151 = vector.shape_cast %150 : vector<1x8x1xf32> to vector<8x1xf32>
    %152 = vector.broadcast %151 : vector<8x1xf32> to vector<8x128xf32>
    %153 = arith.addf %149, %152 : vector<8x128xf32>
    %154 = arith.addf %116, %153 : vector<8x128xf32>
    %155 = arith.mulf %127, %127 : vector<16x128xf32>
    %cst_97 = arith.constant dense<0.000000e+00> : vector<128xf32>
    %156 = vector.multi_reduction <add>, %155, %cst_97 [0] : vector<16x128xf32> to vector<128xf32>
    %157 = vector.shape_cast %156 : vector<128xf32> to vector<1x128xf32>
    %158 = arith.subf %157, %136 : vector<1x128xf32>
    %c0_98 = arith.constant 0 : index
    %c0_99 = arith.constant 0 : index
    %c0_100 = arith.constant 0 : index
    %159 = vector.load %arg9[%c0_98, %c0_99, %c0_100] : memref<1x8x128xf32, #tpu.memory_space<vmem>>, vector<1x8x128xf32>
    %160 = vector.shape_cast %159 : vector<1x8x128xf32> to vector<8x128xf32>
    %161 = vector.shape_cast %154 : vector<8x128xf32> to vector<1x8x128xf32>
    tpu.vector_store %arg9[%c0_98, %c0_99, %c0_100], %161 {strides = array<i32>} : memref<1x8x128xf32, #tpu.memory_space<vmem>>, vector<1x8x128xf32>,
    %162 = tpu.concatenate %25, %64, %103, %142 in 0 : vector<1x128xi32>, vector<1x128xi32>, vector<1x128xi32>, vector<1x128xi32> -> vector<4x128xi32>
    %c0_101 = arith.constant 0 : index
    %c0_102 = arith.constant 0 : index
    %c0_103 = arith.constant 0 : index
    %163 = vector.load %arg10[%c0_101, %c0_102, %c0_103] : memref<1x4x128xi32, #tpu.memory_space<vmem>>, vector<1x4x128xi32>
    %164 = vector.shape_cast %163 : vector<1x4x128xi32> to vector<4x128xi32>
    %165 = vector.shape_cast %162 : vector<4x128xi32> to vector<1x4x128xi32>
    tpu.vector_store %arg10[%c0_101, %c0_102, %c0_103], %165 {strides = array<i32>} : memref<1x4x128xi32, #tpu.memory_space<vmem>>, vector<1x4x128xi32>,
    %166 = tpu.concatenate %42, %81, %120, %158 in 0 : vector<1x128xf32>, vector<1x128xf32>, vector<1x128xf32>, vector<1x128xf32> -> vector<4x128xf32>
    %cst_104 = arith.constant dense<0.000000e+00> : vector<4xf32>
    %167 = vector.multi_reduction <add>, %166, %cst_104 [1] : vector<4x128xf32> to vector<4xf32>
    %168 = vector.shape_cast %167 : vector<4xf32> to vector<4x1xf32>
    %c0_105 = arith.constant 0 : index
    %c0_106 = arith.constant 0 : index
    %c0_107 = arith.constant 0 : index
    %c0_108 = arith.constant 0 : index
    %169 = vector.load %arg11[%c0_105, %c0_106, %c0_107, %c0_108] : memref<1x1x4x1xf32, #tpu.memory_space<vmem>>, vector<1x1x4x1xf32>
    %170 = vector.shape_cast %169 : vector<1x1x4x1xf32> to vector<4x1xf32>
    %171 = vector.shape_cast %168 : vector<4x1xf32> to vector<1x1x4x1xf32>
    tpu.vector_store %arg11[%c0_105, %c0_106, %c0_107, %c0_108], %171 {strides = array<i32>} : memref<1x1x4x1xf32, #tpu.memory_space<vmem>>, vector<1x1x4x1xf32>,
    return
  }
  func.func @transform_0(%arg0: i32, %arg1: i32) -> (i32, i32, i32) {
    %c0_i32 = arith.constant 0 : i32
    %c0_i32_0 = arith.constant 0 : i32
    return %arg0, %c0_i32, %arg1 : i32, i32, i32
  }
  func.func @transform_1(%arg0: i32, %arg1: i32) -> (i32, i32, i32) {
    %c0_i32 = arith.constant 0 : i32
    %c0_i32_0 = arith.constant 0 : i32
    %c0_i32_1 = arith.constant 0 : i32
    %c0_i32_2 = arith.constant 0 : i32
    return %c0_i32, %c0_i32_0, %c0_i32_1 : i32, i32, i32
  }
  func.func @transform_2(%arg0: i32, %arg1: i32) -> (i32, i32, i32) {
    %c0_i32 = arith.constant 0 : i32
    %c0_i32_0 = arith.constant 0 : i32
    %c0_i32_1 = arith.constant 0 : i32
    %c0_i32_2 = arith.constant 0 : i32
    return %c0_i32, %c0_i32_0, %c0_i32_1 : i32, i32, i32
  }
  func.func @transform_3(%arg0: i32, %arg1: i32) -> (i32, i32, i32) {
    %c0_i32 = arith.constant 0 : i32
    %c0_i32_0 = arith.constant 0 : i32
    %c0_i32_1 = arith.constant 0 : i32
    %c0_i32_2 = arith.constant 0 : i32
    return %c0_i32, %c0_i32_0, %c0_i32_1 : i32, i32, i32
  }
  func.func @transform_4(%arg0: i32, %arg1: i32) -> (i32, i32, i32) {
    %c0_i32 = arith.constant 0 : i32
    %c0_i32_0 = arith.constant 0 : i32
    %c0_i32_1 = arith.constant 0 : i32
    %c0_i32_2 = arith.constant 0 : i32
    return %c0_i32, %c0_i32_0, %c0_i32_1 : i32, i32, i32
  }
  func.func @transform_5(%arg0: i32, %arg1: i32) -> (i32, i32, i32) {
    %c0_i32 = arith.constant 0 : i32
    %c0_i32_0 = arith.constant 0 : i32
    %c0_i32_1 = arith.constant 0 : i32
    %c0_i32_2 = arith.constant 0 : i32
    return %c0_i32, %c0_i32_0, %c0_i32_1 : i32, i32, i32
  }
  func.func @transform_6(%arg0: i32, %arg1: i32) -> (i32, i32, i32) {
    %c0_i32 = arith.constant 0 : i32
    %c0_i32_0 = arith.constant 0 : i32
    %c0_i32_1 = arith.constant 0 : i32
    %c0_i32_2 = arith.constant 0 : i32
    return %c0_i32, %c0_i32_0, %c0_i32_1 : i32, i32, i32
  }
  func.func @transform_7(%arg0: i32, %arg1: i32) -> (i32, i32, i32) {
    %c0_i32 = arith.constant 0 : i32
    %c0_i32_0 = arith.constant 0 : i32
    return %arg0, %c0_i32, %arg1 : i32, i32, i32
  }
  func.func @transform_8(%arg0: i32, %arg1: i32) -> (i32, i32, i32) {
    %c0_i32 = arith.constant 0 : i32
    %c0_i32_0 = arith.constant 0 : i32
    return %arg0, %c0_i32, %arg1 : i32, i32, i32
  }
  func.func @transform_9(%arg0: i32, %arg1: i32) -> (i32, i32, i32, i32) {
    %c0_i32 = arith.constant 0 : i32
    %c0_i32_0 = arith.constant 0 : i32
    %c0_i32_1 = arith.constant 0 : i32
    return %arg0, %arg1, %c0_i32, %c0_i32_0 : i32, i32, i32, i32
  }
}

</mosaic_0001>

<bundles_post_ra>
// kernel: tpu_custom_call.1
= control target key start
LH: loop header
LB: loop body
LE: loop exit
PB: predicated region body
PF: predicated region fallthrough
CT: control target
= control target key end

     0   :  { %s3776_s0 = inlined_call_operand.vmem [shape: f32[2,8,128], index: 0, kind: input, shape index: {}]   ;;  %s3777_s1 = inlined_call_operand.vmem [shape: f32[4,16,8], index: 1, kind: input, shape index: {}]   ;;  %s3778_s2 = inlined_call_operand.vmem [shape: f32[4,16,1], index: 2, kind: input, shape index: {}]   ;;  %s3779_s3 = inlined_call_operand.vmem [shape: f32[4,64,16], index: 3, kind: input, shape index: {}]   ;;  %s3780_s4 = inlined_call_operand.vmem [shape: f32[4,64,1], index: 4, kind: input, shape index: {}]   ;;  %s3781_s5 = inlined_call_operand.vmem [shape: f32[4,8,64], index: 5, kind: input, shape index: {}]   ;;  %s3782_s6 = inlined_call_operand.vmem [shape: f32[4,8,1], index: 6, kind: input, shape index: {}]   ;;  %s3783_s7 = inlined_call_operand.hbm [shape: f32[2,8,128], index: 7, kind: output, shape index: {0}]   ;;  %s3784_s8 = inlined_call_operand.hbm [shape: s32[2,4,128], index: 8, kind: output, shape index: {1}]   ;;  %s3785_s9 = inlined_call_operand.vmem [shape: f32[2,1,4,1], index: 9, kind: output, shape index: {2}]  }
   0x1   :  { %3788 = sst [smem:[#allocation8_spill]] %s3776_s0 }
   0x2   :  { %3789 = sst [smem:[#allocation9_spill]] %s3777_s1 }
   0x3   :  { %3790 = sst [smem:[#allocation10_spill]] %s3778_s2 }
   0x4   :  { %3791 = sst [smem:[#allocation11_spill]] %s3779_s3 }
   0x5   :  { %15 = vsyncpa [#allocation3], 0 }
   0x6   :  { %17 = vsyncpa [#allocation3 + $0x1], 0 }
   0x7   :  { %18 = vsyncpa [#allocation5], 0 }
   0x8   :  { %20 = vsyncpa [#allocation5 + $0x1], 0  ;;  %s3101_s30 = smov 0   ;;  %s3103_s10 = smov 0  }
   0x9   :  { %s3105_s11 = smov 0   ;;  %s3107_s12 = smov 0  }
   0xa   :  { %s3109_s13 = smov 0   ;;  %s3111_s14 = smov 0  }
   0xb LB: > { %s2434_s15 = sadd.s32 4294967295, %s3043_s14   ;;  %s2435_s16 = sadd.s32 4294967294, %s3043_s14   ;;  %s3043_s14 = sphi %s3111_s14, %s26_s14   ;;  %s3039_s13 = sphi %s3109_s13, %s3819_s13   ;;  %s3035_s12 = sphi %s3107_s12, %s3818_s12   ;;  %s3031_s11 = sphi %s3105_s11, %s3817_s11   ;;  %s3027_s10 = sphi %s3103_s10, %s3816_s10   ;;  %s3023_s30 = sphi %s3101_s30, %s3815_s30  }
   0xc   : > { %s38_s17 = sadd.s32 1, %s3039_s13  ;;  %s201_s18 = sadd.s32 1, %s3031_s11 }
   0xd   : > { %p40_p0 = scmp.ge.s32.totalorder %s38_s17, 2  ;;  %p211_p1 = scmp.ne.s32.totalorder %s3031_s11, %s3027_s10 }
   0xe   : > { %p212_p2 = scmp.eq.s32.totalorder %s2434_s15, 1  ;;  %p217_p3 = scmp.ne.s32.totalorder %s3027_s10, %s3023_s30 }
   0xf   : > { %s3821_s17 = smov (%p40_p0, %s38_s17), 0  ;;  %p218_p5 = scmp.eq.s32.totalorder %s2435_s16, 1 }
  0x10   : > { %p3141_p4 = por %p212_p2, %p211_p1  ;;  %s196_s20 = ssub.s32 %s3039_s13, %s3821_s17 }
  0x11   : > { %p2438_p6 = scmp.ge.s32.totalorder %s3043_s14, 1  ;;  %p199_p7 = scmp.eq.s32.totalorder %s196_s20, 0 }
  0x12   : > { %p3148_p8 = por %p218_p5, %p217_p3  ;;  %p320_p9 = scmp.lt.s32.totalorder %s3043_s14, 3 }
  0x13   : > { %s3154_s22 = scalar_select %p199_p7, %s3031_s11, %s201_s18  }
  0x14   : > { %p321_p10 = pnand %p2438_p6, %p320_p9 }
  0x15   : > { %s3794_s2 = sld [smem:[#allocation10_spill]] (!%p321_p10)  ;;  %p370_p11 = scmp.lt.s32.totalorder (!%p321_p10), %s3035_s12, 1 }
  0x16   : > { %324 = sbr.rel (%p321_p10) target bundleno = 2697 (0xa89), region = 48  ;;  %s3795_s1 = sld [smem:[#allocation9_spill]] (!%p321_p10) }
  0x17   : > { %s3796_s0 = sld [smem:[#allocation8_spill]] (!%p321_p10)  ;;  %s3682_s18 = sand.u32 (!%p321_p10), 1, %s3027_s10  }
  0x18   : > { %s3797_s3 = sld [smem:[#allocation11_spill]] (!%p321_p10)  ;;  %s2620_s26 = sshll.u32 (!%p321_p10), %s3035_s12, 6 }
  0x19   : > { %s2294_s16 = scalar_lea.hbm (!%p321_p10), %s3784_s8, %s2620_s26  ;;  %s3049_s24 = smov (!%p321_p10), [#allocation4]  }
  0x1a   : > { %s2941_s25 = sshll.u32 (!%p321_p10), %s3049_s24, 4  ;;  %s2942_s25 = int_to_ptr.vmem [resolvable:$false] %s2941_s25 }
  0x1b   : > { %v397_v0 = vld [vmem:[%s3794_s2 + $0x8] sm:$0xff]  ;;  %vm408_vm0 = vcmask 64512   ;;  %v3045_v2 = vmov 0   ;;  %s3165_s27 = scalar_select %p370_p11, %s3035_s12, 1  ;;  %v396_v3 = vld [vmem:[%s3794_s2] sm:$0xff]  ;;  %v630_v6 = vld [vmem:[%s3780_s4 + $0x10] sm:$0xff] }
  0x1c   : > { %v394_v1 = vld [vmem:[%s3795_s1] sm:$0xff]  ;;  %2935 = vset.pattern.permute.xlu0 %v3045_v2  ;;  %2936 = vset.pattern.permute.xlu1 %v3045_v2  ;;  %v395_v5 = vld [vmem:[%s3795_s1 + $0x8] sm:$0xff]  ;;  %v634_v8 = vld [vmem:[%s3780_s4 + $0x30] sm:$0xff]  ;;  %vm3786_vm1 = vcmask 130048   ;;  %vm3787_vm2 = vmmov 0  }
  0x1d   : > { %2713 = vmatprep.mubr.msk.f32.mxu0 %vm408_vm0, %v394_v1  ;;  %405 = vperm.xlu0 %2935, %v397_v0   ;;  %s2441_s15 = sshll.u32 %s3165_s27, 3  ;;  %v632_v7 = vld [vmem:[%s3780_s4 + $0x20] sm:$0xff]  ;;  %v2472_v10 = vld [vmem:[%s3794_s2 + $0x10] sm:$0xff]  ;;  %v2493_v11 = vld [vmem:[%s3780_s4 + $0x48] sm:$0xff]  ;;  %v3046_v1 = vmov 0.0  }
  0x1e   : > { %s376_s20 = scalar_lea.vmem %s3796_s0, %s2441_s15  ;;  %v761_v9 = vld [vmem:[%s3782_s6] sm:$0xff]  ;;  %v2495_v12 = vld [vmem:[%s3780_s4 + $0x58] sm:$0xff]  ;;  %v2497_v13 = vld [vmem:[%s3780_s4 + $0x68] sm:$0xff] }
  0x1f   : > { %v3174_v4 = vld [vmem:[%s376_s20] sm:$0xff]  ;;  %v2499_v14 = vld [vmem:[%s3780_s4 + $0x78] sm:$0xff]  ;;  %v2522_v15 = vld [vmem:[%s3794_s2 + $0x28] sm:$0xff]  ;;  %s2440_s20 = sshll.u32 %s3682_s18, 2 }
  0x20   : > { %2711 = vmatprep.subr.mxu0 %v3174_v4  ;;  %v2541_v16 = vld [vmem:[%s3780_s4 + $0x80] sm:$0xff]  ;;  %v2543_v17 = vld [vmem:[%s3780_s4 + $0x90] sm:$0xff]  ;;  %v629_v23 = vld [vmem:[%s3780_s4 + $0x8] sm:$0xff]  ;;  %s360_s23 = scalar_lea.vmem [#allocation4], %s2440_s20  ;;  %s2261_s20 = scalar_lea.sflag [#allocation5], %s3682_s18 }
  0x21   : > { %400 = vperm.xlu0 %2935, %v396_v3   ;;  %2712 = vmatpush3.msra.mxu0 %v3174_v4  ;;  %v2545_v18 = vld [vmem:[%s3780_s4 + $0xa0] sm:$0xff]  ;;  %v2547_v19 = vld [vmem:[%s3780_s4 + $0xb0] sm:$0xff]  ;;  %v2591_v24 = vld [vmem:[%s3780_s4 + $0xc8] sm:$0xff]  ;;  %s2296_s28 = sshll.u32 %s360_s23, 4  ;;  %s2297_s28 = int_to_ptr.vmem [resolvable:$true] %s2296_s28 }
  0x22   : > { %2714 = vmatmul.mubr.msk.f32.vlgmr.msra.gmra.mxu0 %vm408_vm0, %v395_v5  ;;  %v2558_v20 = vld [vmem:[%s3782_s6 + $0x10] sm:$0xff]  ;;  %v628_v21 = vld [vmem:[%s3780_s4] sm:$0xff]  ;;  %v631_v25 = vld [vmem:[%s3780_s4 + $0x18] sm:$0xff]  ;;  %2732 = vmatprep.subr.mxu0 %v3046_v1  ;;  %s2937_s0 = scalar_lea.vmem %s2297_s28, 64  ;;  %p2944_p1 = scmp.lt.s32.totalorder %s2297_s28, %s2942_s25 }
  0x23   : > { %638 = vperm.xlu1 %2936, %v628_v21   ;;  %v2570_v22 = vld [vmem:[%s3794_s2 + $0x30] sm:$0xff]  ;;  %v2593_v26 = vld [vmem:[%s3780_s4 + $0xd8] sm:$0xff]  ;;  %v490_v27 = vld [vmem:[%s3797_s3] sm:$0xff]  ;;  %2748 = vmatprep.mubr.msk.f32.mxu0 %vm3787_vm2, %v3046_v1  ;;  %p2938_p12 = scmp.ne.s32.totalorder %s2297_s28, %s2937_s0 }
  0x24   : > { %v633_v28 = vld [vmem:[%s3780_s4 + $0x28] sm:$0xff]  ;;  %2720 = vmatprep.mubr.msk.f32.mxu1 %vm3786_vm1, %v490_v27  ;;  %v635_v30 = vld [vmem:[%s3780_s4 + $0x38] sm:$0xff]  ;;  %v2492_v34 = vld [vmem:[%s3780_s4 + $0x40] sm:$0xff] }
  0x25   : > { %648 = vperm.xlu0 %2935, %v630_v6   ;;  %v2595_v29 = vld [vmem:[%s3780_s4 + $0xe8] sm:$0xff]  ;;  %v2597_v31 = vld [vmem:[%s3780_s4 + $0xf8] sm:$0xff]  ;;  %v2494_v35 = vld [vmem:[%s3780_s4 + $0x50] sm:$0xff]  ;;  %p2939_p13 = pnand %p2938_p12, %p3141_p4 }
  0x26   : > { %v2473_v32 = vld [vmem:[%s3794_s2 + $0x18] sm:$0xff]  ;;  %v2496_v36 = vld [vmem:[%s3780_s4 + $0x60] sm:$0xff]  ;;  %v2498_v37 = vld [vmem:[%s3780_s4 + $0x70] sm:$0xff] }
  0x27   : > { %643 = vperm.xlu1 %2936, %v629_v23   ;;  %v2607_v33 = vld [vmem:[%s3782_s6 + $0x18] sm:$0xff]  ;;  %v2509_v38 = vld [vmem:[%s3782_s6 + $0x8] sm:$0xff]  ;;  %v2521_v39 = vld [vmem:[%s3794_s2 + $0x20] sm:$0xff]  ;;  %p2940_p0 = pneg %p2939_p13 }
  0x28   : > { %v2542_v40 = vld [vmem:[%s3780_s4 + $0x88] sm:$0xff]  ;;  %v2544_v41 = vld [vmem:[%s3780_s4 + $0x98] sm:$0xff]  ;;  %v2590_v45 = vld [vmem:[%s3780_s4 + $0xc0] sm:$0xff] }
  0x29   : > { %658 = vperm.xlu0 %2935, %v632_v7   ;;  %v2546_v42 = vld [vmem:[%s3780_s4 + $0xa8] sm:$0xff]  ;;  %v2548_v43 = vld [vmem:[%s3780_s4 + $0xb8] sm:$0xff]  ;;  %v2592_v46 = vld [vmem:[%s3780_s4 + $0xd0] sm:$0xff] }
  0x2a   : > { %v2571_v44 = vld [vmem:[%s3794_s2 + $0x38] sm:$0xff]  ;;  %v2594_v47 = vld [vmem:[%s3780_s4 + $0xe0] sm:$0xff]  ;;  %v2596_v48 = vld [vmem:[%s3780_s4 + $0xf0] sm:$0xff] }
  0x2b   : > { %653 = vperm.xlu1 %2936, %v631_v25   ;;  %v491_v55 = vld [vmem:[%s3797_s3 + $0x8] sm:$0xff]  ;;  %v492_v58 = vld [vmem:[%s3797_s3 + $0x10] sm:$0xff]  ;;  %v493_v60 = vld [vmem:[%s3797_s3 + $0x18] sm:$0xff] }
  0x2c   : > { %v494_v61 = vld [vmem:[%s3797_s3 + $0x20] sm:$0xff]  ;;  %v495_v62 = vld [vmem:[%s3797_s3 + $0x28] sm:$0xff]  ;;  %v496_v63 = vld [vmem:[%s3797_s3 + $0x30] sm:$0xff] }
  0x2d   : > { %668 = vperm.xlu0 %2935, %v634_v8   ;;  %v497_v0 = vld [vmem:[%s3797_s3 + $0x38] sm:$0xff] }
  0x2f   : > { %663 = vperm.xlu1 %2936, %v633_v28  }
  0x31   : > { %764 = vperm.xlu0 %2935, %v761_v9  }
  0x33   : > { %673 = vperm.xlu1 %2936, %v635_v30  }
  0x35   : > { %861 = vperm.xlu0 %2935, %v2472_v10  }
  0x37   : > { %866 = vperm.xlu1 %2936, %v2473_v32  }
  0x39   : > { %1104 = vperm.xlu0 %2935, %v2493_v11  }
  0x3b   : > { %1099 = vperm.xlu1 %2936, %v2492_v34  }
  0x3d   : > { %1114 = vperm.xlu0 %2935, %v2495_v12  }
  0x3f   : > { %1109 = vperm.xlu1 %2936, %v2494_v35  }
  0x41   : > { %1124 = vperm.xlu0 %2935, %v2497_v13  }
  0x43   : > { %1119 = vperm.xlu1 %2936, %v2496_v36  }
  0x45   : > { %1134 = vperm.xlu0 %2935, %v2499_v14  }
  0x47   : > { %1129 = vperm.xlu1 %2936, %v2498_v37  }
  0x49   : > { %1328 = vperm.xlu0 %2935, %v2522_v15  }
  0x4b   : > { %1227 = vperm.xlu1 %2936, %v2509_v38  }
  0x4d   : > { %1561 = vperm.xlu0 %2935, %v2541_v16  }
  0x4f   : > { %1323 = vperm.xlu1 %2936, %v2521_v39   ;;  %v385_v39 = vlaneseq }
  0x51   : > { %1571 = vperm.xlu0 %2935, %v2543_v17  }
  0x53   : > { %1566 = vperm.xlu1 %2936, %v2542_v40  }
  0x55   : > { %1581 = vperm.xlu0 %2935, %v2545_v18  }
  0x57   : > { %1576 = vperm.xlu1 %2936, %v2544_v41  }
  0x59   : > { %1591 = vperm.xlu0 %2935, %v2547_v19  }
  0x5b   : > { %1586 = vperm.xlu1 %2936, %v2546_v42  }
  0x5d   : > { %1689 = vperm.xlu0 %2935, %v2558_v20  }
  0x5f   : > { %1596 = vperm.xlu1 %2936, %v2548_v43   ;;  %v3343_v43 = vshrl.u32 %v385_v39, 7  ;;  %v2483_v39 = vld [vmem:[%s3797_s3 + $0x78] sm:$0xff] }
  0x61   : > { %1785 = vperm.xlu0 %2935, %v2570_v22  }
  0x63   : > { %1790 = vperm.xlu1 %2936, %v2571_v44  }
  0x65   : > { %2028 = vperm.xlu0 %2935, %v2591_v24  }
  0x67   : > { %2023 = vperm.xlu1 %2936, %v2590_v45  }
  0x69   : > { %2038 = vperm.xlu0 %2935, %v2593_v26  }
  0x6b   : > { %2033 = vperm.xlu1 %2936, %v2592_v46  }
  0x6d   : > { %2048 = vperm.xlu0 %2935, %v2595_v29  }
  0x6f   : > { %2043 = vperm.xlu1 %2936, %v2594_v47   ;;  %v3348_v47 = vadd.s32 8, %v3343_v43 }
  0x71   : > { %2058 = vperm.xlu0 %2935, %v2597_v31  }
  0x73   : > { %2053 = vperm.xlu1 %2936, %v2596_v48   ;;  %v3351_v48 = vadd.s32 16, %v3343_v43 }
  0x75   : > { %2151 = vperm.xlu0 %2935, %v2607_v33  }
  0x98   : > { %v406_v49 = vpop.permute.xlu0 %405 }
  0x9c   : > { %v401_v52 = vpop.permute.xlu0 %400 }
  0x9e   : > { %v639_v2 = vpop.permute.xlu1 %638 }
  0xa0   : > { %v649_v7 = vpop.permute.xlu0 %648 }
  0xa2   : > { %v644_v3 = vpop.permute.xlu1 %643 }
  0xa4   : > { %v659_v12 = vpop.permute.xlu0 %658 }
  0xa6   : > { %v654_v5 = vpop.permute.xlu1 %653 }
  0xa8   : > { %v669_v22 = vpop.permute.xlu0 %668 }
  0xaa   : > { %v664_v10 = vpop.permute.xlu1 %663 }
  0xae   : > { %v674_v17 = vpop.permute.xlu1 %673 }
  0xe2   : > { %v2715_v50 = vpop.f32.mrf.mxu0 }
  0xe3   : > { %v487_v51 = vadd.f32 %v2715_v50, %v406_v49  ;;  %v3354_v49 = vadd.s32 24, %v3343_v43 }
  0xe4   : > { %v481_v53 = vpop.f32.mrf.mxu0 }
  0xe5   : > { %v482_v54 = vadd.f32 %v481_v53, %v401_v52  ;;  %2716 = vmatprep.subr.mxu1 %v487_v51  ;;  %v844_v56 = vmul.f32 %v487_v51, %v487_v51  ;;  %v3362_v52 = vadd.s32 40, %v3343_v43  ;;  %v3365_v53 = vadd.s32 48, %v3343_v43 }
  0xe6   : > { %2717 = vmatpush3.msra.mxu1 %v487_v51  ;;  %v3359_v51 = vadd.s32 32, %v3343_v43 }
  0xe7   : > { %v843_v57 = vmul.f32 %v482_v54, %v482_v54  ;;  %2718 = vmatprep.subr.mxu1 %v482_v54 }
  0xe8   : > { %2719 = vmatpush3.msra.mxu1 %v482_v54  ;;  %v3368_v54 = vadd.s32 56, %v3343_v43 }
  0xe9   : > { %v845_v59 = vadd.f32 %v844_v56, %v843_v57  ;;  %2721 = vmatmul.mubr.msk.f32.vlgmr.msra.gmra.mxu1 %vm3786_vm1, %v491_v55 }
  0xea   : > { %2723 = vmatprep.mubr.msk.f32.mxu1 %vm3786_vm1, %v492_v58 }
  0xeb   : > { %v846_v16 = vrot.slane %v845_v59, 4 }
  0xed   : > { %2724 = vmatmul.mubr.msk.f32.gmra.mxu1 %vm3786_vm1, %v493_v60  ;;  %v847_v29 = vadd.f32 %v846_v16, %v845_v59  ;;  %v760_v16 = vld [vmem:[%s3781_s5] sm:$0xff] }
  0xee   : > { %2726 = vmatprep.mubr.msk.f32.mxu1 %vm3786_vm1, %v494_v61 }
  0xef   : > { %v848_v35 = vrot.slane %v847_v29, 2 }
  0xf1   : > { %2727 = vmatmul.mubr.msk.f32.gmra.mxu1 %vm3786_vm1, %v495_v62  ;;  %v849_v38 = vadd.f32 %v848_v35, %v847_v29  ;;  %v2479_v35 = vld [vmem:[%s3797_s3 + $0x58] sm:$0xff] }
  0xf2   : > { %2729 = vmatprep.mubr.msk.f32.mxu1 %vm3786_vm1, %v496_v63 }
  0xf3   : > { %v850_v42 = vrot.slane %v849_v38, 1 }
  0xf5   : > { %2730 = vmatmul.mubr.msk.f32.gmra.mxu1 %vm3786_vm1, %v497_v0  ;;  %v3345_v46 = vadd.f32 %v850_v42, %v849_v38  ;;  %v2482_v38 = vld [vmem:[%s3797_s3 + $0x70] sm:$0xff] }
 0x1a9   : > { %v2722_v6 = vpop.f32.mrf.mxu1 }
 0x1aa   : > { %v677_v23 = vsub.f32 %v2722_v6, %v644_v3 }
 0x1ab   : > { %v589_v8 = vpop.f32.mrf.mxu1 }
 0x1ac   : > { %v676_v19 = vsub.f32 %v589_v8, %v639_v2 }
 0x1ad   : > { %v2725_v9 = vpop.f32.mrf.mxu1 }
 0x1ae   : > { %v679_v25 = vsub.f32 %v2725_v9, %v654_v5 }
 0x1af   : > { %v599_v11 = vpop.f32.mrf.mxu1 }
 0x1b0   : > { %v678_v26 = vsub.f32 %v599_v11, %v649_v7 }
 0x1b1   : > { %v2728_v13 = vpop.f32.mrf.mxu1 }
 0x1b2   : > { %v681_v20 = vsub.f32 %v2728_v13, %v664_v10 }
 0x1b3   : > { %v609_v14 = vpop.f32.mrf.mxu1 }
 0x1b4   : > { %v680_v15 = vsub.f32 %v609_v14, %v659_v12  ;;  %v685_v30 = vmax.f32 %v677_v23, %v681_v20 }
 0x1b5   : > { %v2731_v18 = vpop.f32.mrf.mxu1 }
 0x1b6   : > { %v683_v21 = vsub.f32 %v2731_v18, %v674_v17  ;;  %v684_v27 = vmax.f32 %v676_v19, %v680_v15  ;;  %v2470_v17 = vld [vmem:[%s3795_s1 + $0x10] sm:$0xff]  ;;  %v765_v18 = vpop.permute.xlu0 %764 }
 0x1b7   : > { %v619_v24 = vpop.f32.mrf.mxu1  ;;  %2753 = vmatprep.mubr.msk.f32.mxu1 %vm408_vm0, %v2470_v17 }
 0x1b8   : > { %v682_v28 = vsub.f32 %v619_v24, %v669_v22  ;;  %v687_v31 = vmax.f32 %v679_v25, %v683_v21  ;;  %v688_v33 = vmax.f32 %v684_v27, %v685_v30  ;;  %v867_v24 = vpop.permute.xlu1 %866  ;;  %v2477_v30 = vld [vmem:[%s3797_s3 + $0x48] sm:$0xff] }
 0x1ba   : > { %v686_v32 = vmax.f32 %v678_v26, %v682_v28  ;;  %v862_v27 = vpop.permute.xlu0 %861 }
 0x1bc   : > { %v689_v34 = vmax.f32 %v686_v32, %v687_v31 }
 0x1be   : > { %v690_v36 = vmax.f32 %v688_v33, %v689_v34  ;;  %v2478_v33 = vld [vmem:[%s3797_s3 + $0x50] sm:$0xff] }
 0x1c0   : > { %v691_v37 = vrot.slane %v690_v36, 4 }
 0x1c2   : > { %v692_v40 = vmax.f32 %v690_v36, %v691_v37  ;;  %v2480_v36 = vld [vmem:[%s3797_s3 + $0x60] sm:$0xff]  ;;  %v2481_v37 = vld [vmem:[%s3797_s3 + $0x68] sm:$0xff] }
 0x1c4   : > { %v693_v41 = vrot.slane %v692_v40, 2 }
 0x1c6   : > { %v694_v44 = vmax.f32 %v692_v40, %v693_v41  ;;  %v1105_v40 = vpop.permute.xlu0 %1104  ;;  %v1100_v41 = vpop.permute.xlu1 %1099 }
 0x1c8   : > { %v695_v45 = vrot.slane %v694_v44, 1 }
 0x1ca   : > { %v3356_v50 = vmax.f32 %v694_v44, %v695_v45  ;;  %v1115_v42 = vpop.permute.xlu0 %1114  ;;  %v1110_v45 = vpop.permute.xlu1 %1109 }
 0x1cc   : > { %vm697_vm3 = vcmp.eq.f32.partialorder %v676_v19, %v3356_v50  ;;  %vm698_vm4 = vcmp.eq.f32.partialorder %v677_v23, %v3356_v50  ;;  %vm699_vm5 = vcmp.eq.f32.partialorder %v678_v26, %v3356_v50  ;;  %vm700_vm6 = vcmp.eq.f32.partialorder %v679_v25, %v3356_v50  ;;  %v2471_v23 = vld [vmem:[%s3795_s1 + $0x18] sm:$0xff] }
 0x1cd   : > { %vm701_vm7 = vcmp.eq.f32.partialorder %v680_v15, %v3356_v50  ;;  %vm702_vm8 = vcmp.eq.f32.partialorder %v681_v20, %v3356_v50  ;;  %vm703_vm9 = vcmp.eq.f32.partialorder %v682_v28, %v3356_v50  ;;  %vm704_vm10 = vcmp.eq.f32.partialorder %v683_v21, %v3356_v50 }
 0x1ce   : > { %v705_v55 = vsel %vm697_vm3, %v3343_v43, 64  ;;  %v706_v56 = vsel %vm698_vm4, %v3348_v47, 64  ;;  %v707_v57 = vsel %vm699_vm5, %v3351_v48, 64  ;;  %v708_v58 = vsel %vm700_vm6, %v3354_v49, 64 }
 0x1cf   : > { %v709_v59 = vsel %vm701_vm7, %v3359_v51, 64  ;;  %v710_v60 = vsel %vm702_vm8, %v3362_v52, 64  ;;  %v711_v61 = vsel %vm703_vm9, %v3365_v53, 64  ;;  %v712_v62 = vsel %vm704_vm10, %v3368_v54, 64 }
 0x1d0   : > { %vm713_vm11 = vcmp.lt.s32.totalorder %v705_v55, %v709_v59  ;;  %vm715_vm12 = vcmp.lt.s32.totalorder %v706_v56, %v710_v60  ;;  %vm717_vm13 = vcmp.lt.s32.totalorder %v707_v57, %v711_v61  ;;  %vm719_vm14 = vcmp.lt.s32.totalorder %v708_v58, %v712_v62 }
 0x1d1   : > { %v714_v63 = vsel %vm713_vm11, %v705_v55, %v709_v59  ;;  %v716_v0 = vsel %vm715_vm12, %v706_v56, %v710_v60  ;;  %v718_v2 = vsel %vm717_vm13, %v707_v57, %v711_v61  ;;  %v720_v3 = vsel %vm719_vm14, %v708_v58, %v712_v62  ;;  %v1125_v57 = vpop.permute.xlu0 %1124  ;;  %v1120_v59 = vpop.permute.xlu1 %1119 }
 0x1d2   : > { %vm721_vm15 = vcmp.lt.s32.totalorder %v714_v63, %v716_v0  ;;  %vm723_vm3 = vcmp.lt.s32.totalorder %v718_v2, %v720_v3  ;;  %v852_v5 = vsub.f32 %v3345_v46, %v3356_v50  ;;  %v3048_v15 = vmov 1.0   ;;  %v2508_v46 = vld [vmem:[%s3781_s5 + $0x8] sm:$0xff]  ;;  %v2519_v50 = vld [vmem:[%s3795_s1 + $0x20] sm:$0xff] }
 0x1d3   : > { %v722_v6 = vsel %vm721_vm15, %v714_v63, %v716_v0  ;;  %v724_v7 = vsel %vm723_vm3, %v718_v2, %v720_v3  ;;  %vm767_vm15 = vcmask 523264  }
 0x1d4   : > { %vm725_vm4 = vcmp.lt.s32.totalorder %v722_v6, %v724_v7 }
 0x1d5   : > { %v726_v8 = vsel %vm725_vm4, %v722_v6, %v724_v7  ;;  %v1135_v63 = vpop.permute.xlu0 %1134  ;;  %v1130_v7 = vpop.permute.xlu1 %1129  ;;  %vm2239_vm4 = vcmask 1040384  }
 0x1d6   : > { %v727_v9 = vrot.slane %v726_v8, 4 }
 0x1d8   : > { %vm728_vm5 = vcmp.lt.s32.totalorder %v726_v8, %v727_v9 }
 0x1d9   : > { %v729_v10 = vsel %vm728_vm5, %v726_v8, %v727_v9 }
 0x1da   : > { %v730_v11 = vrot.slane %v729_v10, 2 }
 0x1dc   : > { %vm731_vm6 = vcmp.lt.s32.totalorder %v729_v10, %v730_v11 }
 0x1dd   : > { %v732_v12 = vsel %vm731_vm6, %v729_v10, %v730_v11 }
 0x1de   : > { %v733_v13 = vrot.slane %v732_v12, 1 }
 0x1e0   : > { %vm734_vm7 = vcmp.lt.s32.totalorder %v732_v12, %v733_v13 }
 0x1e1   : > { %v3388_v14 = vsel %vm734_vm7, %v732_v12, %v733_v13 }
 0x1e2   : > { %vm743_vm8 = vcmp.eq.s32.totalorder %v3368_v54, %v3388_v14  ;;  %vm742_vm9 = vcmp.eq.s32.totalorder %v3365_v53, %v3388_v14  ;;  %vm741_vm10 = vcmp.eq.s32.totalorder %v3362_v52, %v3388_v14  ;;  %vm740_vm11 = vcmp.eq.s32.totalorder %v3359_v51, %v3388_v14 }
 0x1e3   : > { %2733 = vmatpush3.msk.msra.mxu0 %vm743_vm8, %v3048_v15  ;;  %vm739_vm12 = vcmp.eq.s32.totalorder %v3354_v49, %v3388_v14  ;;  %vm738_vm13 = vcmp.eq.s32.totalorder %v3351_v48, %v3388_v14  ;;  %vm737_vm14 = vcmp.eq.s32.totalorder %v3348_v47, %v3388_v14  ;;  %vm736_vm3 = vcmp.eq.s32.totalorder %v3343_v43, %v3388_v14 }
 0x1e4   : > { %2734 = vmatprep.subr.mxu0 %v3046_v1 }
 0x1e5   : > { %2735 = vmatpush3.msk.msra.mxu0 %vm742_vm9, %v3048_v15 }
 0x1e6   : > { %2736 = vmatprep.subr.mxu0 %v3046_v1 }
 0x1e7   : > { %2737 = vmatpush3.msk.msra.mxu0 %vm741_vm10, %v3048_v15 }
 0x1e8   : > { %2738 = vmatprep.subr.mxu0 %v3046_v1 }
 0x1e9   : > { %2739 = vmatpush3.msk.msra.mxu0 %vm740_vm11, %v3048_v15 }
 0x1ea   : > { %2740 = vmatprep.subr.mxu0 %v3046_v1 }
 0x1eb   : > { %2741 = vmatpush3.msk.msra.mxu0 %vm739_vm12, %v3048_v15 }
 0x1ec   : > { %2742 = vmatprep.subr.mxu0 %v3046_v1 }
 0x1ed   : > { %2743 = vmatpush3.msk.msra.mxu0 %vm738_vm13, %v3048_v15 }
 0x1ee   : > { %2744 = vmatprep.subr.mxu0 %v3046_v1 }
 0x1ef   : > { %2745 = vmatpush3.msk.msra.mxu0 %vm737_vm14, %v3048_v15 }
 0x1f0   : > { %2746 = vmatprep.subr.mxu0 %v3046_v1 }
 0x1f1   : > { %2747 = vmatpush3.msk.msra.mxu0 %vm736_vm3, %v3048_v15 }
 0x1f2   : > { %2749 = vmatmul.mubr.msk.f32.vlgmr.msra.gmra.mxu0 %vm767_vm15, %v760_v16 }
 0x2b2   : > { %v837_v19 = vpop.f32.mrf.mxu0 }
 0x2b3   : > { %v3429_v20 = vadd.f32 %v837_v19, %v765_v18 }
 0x2b4   : > { %v2750_v21 = vpop.f32.mrf.mxu0 }
 0x2b5   : > { %v3433_v22 = vsub.f32 %v3174_v4, %v3429_v20  ;;  %v2476_v4 = vld [vmem:[%s3797_s3 + $0x40] sm:$0xff] }
 0x2b6   : > { %2760 = vmatprep.mubr.msk.f32.mxu0 %vm3786_vm1, %v2476_v4 }
 0x2b7   : > { %2751 = vmatprep.subr.mxu1 %v3433_v22 }
 0x2b8   : > { %2752 = vmatpush3.msra.mxu1 %v3433_v22 }
 0x2b9   : > { %2754 = vmatmul.mubr.msk.f32.vlgmr.msra.gmra.mxu1 %vm408_vm0, %v2471_v23  ;;  %2772 = vmatprep.subr.mxu1 %v3046_v1 }
 0x2ba   : > { %2788 = vmatprep.mubr.msk.f32.mxu1 %vm3787_vm2, %v3046_v1 }
 0x379   : > { %v2755_v25 = vpop.f32.mrf.mxu1 }
 0x37a   : > { %v947_v26 = vadd.f32 %v2755_v25, %v867_v24 }
 0x37b   : > { %v941_v28 = vpop.f32.mrf.mxu1 }
 0x37c   : > { %v942_v29 = vadd.f32 %v941_v28, %v862_v27  ;;  %2756 = vmatprep.subr.mxu0 %v947_v26  ;;  %v1306_v31 = vmul.f32 %v947_v26, %v947_v26 }
 0x37d   : > { %2757 = vmatpush3.msra.mxu0 %v947_v26 }
 0x37e   : > { %v1305_v32 = vmul.f32 %v942_v29, %v942_v29  ;;  %2758 = vmatprep.subr.mxu0 %v942_v29 }
 0x37f   : > { %2759 = vmatpush3.msra.mxu0 %v942_v29 }
 0x380   : > { %v1307_v34 = vadd.f32 %v1306_v31, %v1305_v32  ;;  %2761 = vmatmul.mubr.msk.f32.vlgmr.msra.gmra.mxu0 %vm3786_vm1, %v2477_v30 }
 0x381   : > { %2763 = vmatprep.mubr.msk.f32.mxu0 %vm3786_vm1, %v2478_v33 }
 0x382   : > { %v1308_v8 = vrot.slane %v1307_v34, 4 }
 0x384   : > { %2764 = vmatmul.mubr.msk.f32.gmra.mxu0 %vm3786_vm1, %v2479_v35  ;;  %v1309_v21 = vadd.f32 %v1308_v8, %v1307_v34 }
 0x385   : > { %2766 = vmatprep.mubr.msk.f32.mxu0 %vm3786_vm1, %v2480_v36 }
 0x386   : > { %v1310_v25 = vrot.slane %v1309_v21, 2 }
 0x388   : > { %2767 = vmatmul.mubr.msk.f32.gmra.mxu0 %vm3786_vm1, %v2481_v37  ;;  %v1311_v28 = vadd.f32 %v1310_v25, %v1309_v21  ;;  %v2526_v21 = vld [vmem:[%s3797_s3 + $0x88] sm:$0xff] }
 0x389   : > { %2769 = vmatprep.mubr.msk.f32.mxu0 %vm3786_vm1, %v2482_v38 }
 0x38a   : > { %v1312_v31 = vrot.slane %v1311_v28, 1 }
 0x38c   : > { %2770 = vmatmul.mubr.msk.f32.gmra.mxu0 %vm3786_vm1, %v2483_v39  ;;  %v1313_v35 = vadd.f32 %v1312_v31, %v1311_v28  ;;  %v2530_v28 = vld [vmem:[%s3797_s3 + $0xa8] sm:$0xff] }
 0x38d   : > { %2793 = vmatprep.mubr.msk.f32.mxu0 %vm408_vm0, %v2519_v50 }
 0x440   : > { %v2762_v44 = vpop.f32.mrf.mxu0 }
 0x441   : > { %v1138_v9 = vsub.f32 %v2762_v44, %v1105_v40 }
 0x442   : > { %v1049_v55 = vpop.f32.mrf.mxu0 }
 0x443   : > { %v1137_v2 = vsub.f32 %v1049_v55, %v1100_v41 }
 0x444   : > { %v2765_v56 = vpop.f32.mrf.mxu0 }
 0x445   : > { %v1140_v11 = vsub.f32 %v2765_v56, %v1115_v42 }
 0x446   : > { %v1059_v58 = vpop.f32.mrf.mxu0 }
 0x447   : > { %v1139_v12 = vsub.f32 %v1059_v58, %v1110_v45 }
 0x448   : > { %v2768_v60 = vpop.f32.mrf.mxu0 }
 0x449   : > { %v1142_v3 = vsub.f32 %v2768_v60, %v1125_v57 }
 0x44a   : > { %v1069_v61 = vpop.f32.mrf.mxu0 }
 0x44b   : > { %v1141_v62 = vsub.f32 %v1069_v61, %v1120_v59  ;;  %v1146_v17 = vmax.f32 %v1138_v9, %v1142_v3 }
 0x44c   : > { %v2771_v0 = vpop.f32.mrf.mxu0 }
 0x44d   : > { %v1144_v6 = vsub.f32 %v2771_v0, %v1135_v63  ;;  %v1145_v13 = vmax.f32 %v1137_v2, %v1141_v62 }
 0x44e   : > { %v1079_v10 = vpop.f32.mrf.mxu0 }
 0x44f   : > { %v1143_v16 = vsub.f32 %v1079_v10, %v1130_v7  ;;  %v1148_v18 = vmax.f32 %v1140_v11, %v1144_v6  ;;  %v1149_v23 = vmax.f32 %v1145_v13, %v1146_v17 }
 0x451   : > { %v1147_v19 = vmax.f32 %v1139_v12, %v1143_v16 }
 0x453   : > { %v1150_v4 = vmax.f32 %v1147_v19, %v1148_v18 }
 0x455   : > { %v1151_v24 = vmax.f32 %v1149_v23, %v1150_v4 }
 0x457   : > { %v1152_v26 = vrot.slane %v1151_v24, 4 }
 0x459   : > { %v1153_v27 = vmax.f32 %v1151_v24, %v1152_v26  ;;  %v2527_v24 = vld [vmem:[%s3797_s3 + $0x90] sm:$0xff]  ;;  %v2528_v26 = vld [vmem:[%s3797_s3 + $0x98] sm:$0xff] }
 0x45b   : > { %v1154_v29 = vrot.slane %v1153_v27, 2 }
 0x45d   : > { %v1155_v30 = vmax.f32 %v1153_v27, %v1154_v29  ;;  %v2529_v27 = vld [vmem:[%s3797_s3 + $0xa0] sm:$0xff]  ;;  %v2531_v29 = vld [vmem:[%s3797_s3 + $0xb0] sm:$0xff] }
 0x45f   : > { %v1156_v32 = vrot.slane %v1155_v30, 1 }
 0x461   : > { %v1157_v33 = vmax.f32 %v1155_v30, %v1156_v32  ;;  %v2532_v30 = vld [vmem:[%s3797_s3 + $0xb8] sm:$0xff] }
 0x463   : > { %vm1158_vm5 = vcmp.eq.f32.partialorder %v1137_v2, %v1157_v33  ;;  %vm1159_vm6 = vcmp.eq.f32.partialorder %v1138_v9, %v1157_v33  ;;  %vm1160_vm7 = vcmp.eq.f32.partialorder %v1139_v12, %v1157_v33  ;;  %vm1161_vm8 = vcmp.eq.f32.partialorder %v1140_v11, %v1157_v33  ;;  %v2520_v11 = vld [vmem:[%s3795_s1 + $0x28] sm:$0xff]  ;;  %v1329_v12 = vpop.permute.xlu0 %1328 }
 0x464   : > { %vm1162_vm9 = vcmp.eq.f32.partialorder %v1141_v62, %v1157_v33  ;;  %vm1163_vm10 = vcmp.eq.f32.partialorder %v1142_v3, %v1157_v33  ;;  %vm1164_vm11 = vcmp.eq.f32.partialorder %v1143_v16, %v1157_v33  ;;  %vm1165_vm12 = vcmp.eq.f32.partialorder %v1144_v6, %v1157_v33 }
 0x465   : > { %v1166_v34 = vsel %vm1158_vm5, %v3343_v43, 64  ;;  %v1167_v36 = vsel %vm1159_vm6, %v3348_v47, 64  ;;  %v1168_v37 = vsel %vm1160_vm7, %v3351_v48, 64  ;;  %v1169_v38 = vsel %vm1161_vm8, %v3354_v49, 64 }
 0x466   : > { %v1170_v39 = vsel %vm1162_vm9, %v3359_v51, 64  ;;  %v1171_v40 = vsel %vm1163_vm10, %v3362_v52, 64  ;;  %v1172_v41 = vsel %vm1164_vm11, %v3365_v53, 64  ;;  %v1173_v42 = vsel %vm1165_vm12, %v3368_v54, 64 }
 0x467   : > { %vm1174_vm13 = vcmp.lt.s32.totalorder %v1166_v34, %v1170_v39  ;;  %vm1176_vm14 = vcmp.lt.s32.totalorder %v1167_v36, %v1171_v40  ;;  %vm1178_vm3 = vcmp.lt.s32.totalorder %v1168_v37, %v1172_v41  ;;  %vm1180_vm1 = vcmp.lt.s32.totalorder %v1169_v38, %v1173_v42  ;;  %v1562_v32 = vpop.permute.xlu0 %1561 }
 0x468   : > { %v1175_v44 = vsel %vm1174_vm13, %v1166_v34, %v1170_v39  ;;  %v1177_v45 = vsel %vm1176_vm14, %v1167_v36, %v1171_v40  ;;  %v1179_v55 = vsel %vm1178_vm3, %v1168_v37, %v1172_v41  ;;  %v1181_v56 = vsel %vm1180_vm1, %v1169_v38, %v1173_v42 }
 0x469   : > { %vm1182_vm5 = vcmp.lt.s32.totalorder %v1175_v44, %v1177_v45  ;;  %vm1184_vm6 = vcmp.lt.s32.totalorder %v1179_v55, %v1181_v56  ;;  %v1314_v57 = vsub.f32 %v1313_v35, %v1157_v33 }
 0x46a   : > { %v1183_v58 = vsel %vm1182_vm5, %v1175_v44, %v1177_v45  ;;  %v1185_v59 = vsel %vm1184_vm6, %v1179_v55, %v1181_v56 }
 0x46b   : > { %vm1186_vm7 = vcmp.lt.s32.totalorder %v1183_v58, %v1185_v59  ;;  %v3488_v60 = vsel %vm2239_vm4, %v852_v5, %v1314_v57  ;;  %v1228_v5 = vpop.permute.xlu1 %1227  ;;  %v1572_v34 = vpop.permute.xlu0 %1571 }
 0x46c   : > { %v1187_v61 = vsel %vm1186_vm7, %v1183_v58, %v1185_v59  ;;  %vm3798_vm7 = vcmask 130048  }
 0x46d   : > { %v1188_v62 = vrot.slane %v1187_v61, 4 }
 0x46f   : > { %vm1189_vm8 = vcmp.lt.s32.totalorder %v1187_v61, %v1188_v62  ;;  %v1324_v17 = vpop.permute.xlu1 %1323  ;;  %v1582_v40 = vpop.permute.xlu0 %1581 }
 0x470   : > { %v1190_v63 = vsel %vm1189_vm8, %v1187_v61, %v1188_v62  ;;  %vm3799_vm8 = vmmov %vm3798_vm7 }
 0x471   : > { %v1191_v0 = vrot.slane %v1190_v63, 2 }
 0x473   : > { %vm1192_vm9 = vcmp.lt.s32.totalorder %v1190_v63, %v1191_v0  ;;  %v1567_v31 = vpop.permute.xlu1 %1566  ;;  %v1592_v59 = vpop.permute.xlu0 %1591 }
 0x474   : > { %v1193_v2 = vsel %vm1192_vm9, %v1190_v63, %v1191_v0  ;;  %vm3800_vm9 = vmmov %vm3798_vm7 }
 0x475   : > { %v1194_v3 = vrot.slane %v1193_v2, 1 }
 0x477   : > { %vm1195_vm1 = vcmp.lt.s32.totalorder %v1193_v2, %v1194_v3  ;;  %v1577_v33 = vpop.permute.xlu1 %1576 }
 0x478   : > { %v3490_v6 = vsel %vm1195_vm1, %v1193_v2, %v1194_v3  ;;  %vm3801_vm1 = vmmov %vm3798_vm7 }
 0x479   : > { %vm1204_vm10 = vcmp.eq.s32.totalorder %v3368_v54, %v3490_v6  ;;  %vm1203_vm11 = vcmp.eq.s32.totalorder %v3365_v53, %v3490_v6  ;;  %vm1202_vm12 = vcmp.eq.s32.totalorder %v3362_v52, %v3490_v6  ;;  %vm1201_vm13 = vcmp.eq.s32.totalorder %v3359_v51, %v3490_v6 }
 0x47a   : > { %2773 = vmatpush3.msk.msra.mxu1 %vm1204_vm10, %v3048_v15  ;;  %vm1200_vm14 = vcmp.eq.s32.totalorder %v3354_v49, %v3490_v6  ;;  %vm1199_vm3 = vcmp.eq.s32.totalorder %v3351_v48, %v3490_v6  ;;  %vm1198_vm5 = vcmp.eq.s32.totalorder %v3348_v47, %v3490_v6  ;;  %vm1197_vm6 = vcmp.eq.s32.totalorder %v3343_v43, %v3490_v6  ;;  %vm3802_vm10 = vmmov %vm3801_vm1 }
 0x47b   : > { %2774 = vmatprep.subr.mxu1 %v3046_v1  ;;  %v1587_v38 = vpop.permute.xlu1 %1586 }
 0x47c   : > { %2775 = vmatpush3.msk.msra.mxu1 %vm1203_vm11, %v3048_v15  ;;  %vm3803_vm11 = vmmov %vm3801_vm1 }
 0x47d   : > { %2776 = vmatprep.subr.mxu1 %v3046_v1 }
 0x47e   : > { %2777 = vmatpush3.msk.msra.mxu1 %vm1202_vm12, %v3048_v15  ;;  %vm3804_vm12 = vmmov %vm3801_vm1 }
 0x47f   : > { %2778 = vmatprep.subr.mxu1 %v3046_v1  ;;  %v1597_v45 = vpop.permute.xlu1 %1596 }
 0x480   : > { %2779 = vmatpush3.msk.msra.mxu1 %vm1201_vm13, %v3048_v15  ;;  %vm3805_vm13 = vmmov %vm3801_vm1 }
 0x481   : > { %2780 = vmatprep.subr.mxu1 %v3046_v1 }
 0x482   : > { %2781 = vmatpush3.msk.msra.mxu1 %vm1200_vm14, %v3048_v15  ;;  %vm2241_vm14 = vcmask 1041408  }
 0x483   : > { %2782 = vmatprep.subr.mxu1 %v3046_v1 }
 0x484   : > { %2783 = vmatpush3.msk.msra.mxu1 %vm1199_vm3, %v3048_v15 }
 0x485   : > { %2784 = vmatprep.subr.mxu1 %v3046_v1 }
 0x486   : > { %2785 = vmatpush3.msk.msra.mxu1 %vm1198_vm5, %v3048_v15 }
 0x487   : > { %2786 = vmatprep.subr.mxu1 %v3046_v1 }
 0x488   : > { %2787 = vmatpush3.msk.msra.mxu1 %vm1197_vm6, %v3048_v15 }
 0x489   : > { %2789 = vmatmul.mubr.msk.f32.vlgmr.msra.gmra.mxu1 %vm767_vm15, %v2508_v46 }
 0x549   : > { %v1299_v7 = vpop.f32.mrf.mxu1 }
 0x54a   : > { %v3531_v8 = vadd.f32 %v1299_v7, %v1228_v5 }
 0x54b   : > { %v2790_v9 = vpop.f32.mrf.mxu1 }
 0x54c   : > { %v3535_v10 = vsub.f32 %v3433_v22, %v3531_v8  ;;  %v2525_v22 = vld [vmem:[%s3797_s3 + $0x80] sm:$0xff] }
 0x54d   : > { %2800 = vmatprep.mubr.msk.f32.mxu1 %vm3798_vm7, %v2525_v22 }
 0x54e   : > { %2791 = vmatprep.subr.mxu0 %v3535_v10 }
 0x54f   : > { %2792 = vmatpush3.msra.mxu0 %v3535_v10 }
 0x550   : > { %2794 = vmatmul.mubr.msk.f32.vlgmr.msra.gmra.mxu0 %vm408_vm0, %v2520_v11  ;;  %2812 = vmatprep.subr.mxu0 %v3046_v1 }
 0x551   : > { %2828 = vmatprep.mubr.msk.f32.mxu0 %vm3787_vm2, %v3046_v1 }
 0x610   : > { %v2795_v13 = vpop.f32.mrf.mxu0 }
 0x611   : > { %v1409_v16 = vadd.f32 %v2795_v13, %v1329_v12 }
 0x612   : > { %v1403_v18 = vpop.f32.mrf.mxu0 }
 0x613   : > { %v1404_v19 = vadd.f32 %v1403_v18, %v1324_v17  ;;  %2796 = vmatprep.subr.mxu1 %v1409_v16  ;;  %v1768_v23 = vmul.f32 %v1409_v16, %v1409_v16 }
 0x614   : > { %2797 = vmatpush3.msra.mxu1 %v1409_v16 }
 0x615   : > { %v1767_v4 = vmul.f32 %v1404_v19, %v1404_v19  ;;  %2798 = vmatprep.subr.mxu1 %v1404_v19 }
 0x616   : > { %2799 = vmatpush3.msra.mxu1 %v1404_v19 }
 0x617   : > { %v1769_v25 = vadd.f32 %v1768_v23, %v1767_v4  ;;  %2801 = vmatmul.mubr.msk.f32.vlgmr.msra.gmra.mxu1 %vm3799_vm8, %v2526_v21 }
 0x618   : > { %2803 = vmatprep.mubr.msk.f32.mxu1 %vm3800_vm9, %v2527_v24 }
 0x619   : > { %v1770_v61 = vrot.slane %v1769_v25, 4 }
 0x61b   : > { %2804 = vmatmul.mubr.msk.f32.gmra.mxu1 %vm3801_vm1, %v2528_v26  ;;  %v1771_v9 = vadd.f32 %v1770_v61, %v1769_v25  ;;  %v1690_v61 = vpop.permute.xlu0 %1689 }
 0x61c   : > { %2806 = vmatprep.mubr.msk.f32.mxu1 %vm3802_vm10, %v2529_v27 }
 0x61d   : > { %v1772_v13 = vrot.slane %v1771_v9, 2 }
 0x61f   : > { %2807 = vmatmul.mubr.msk.f32.gmra.mxu1 %vm3803_vm11, %v2530_v28  ;;  %v1773_v18 = vadd.f32 %v1772_v13, %v1771_v9 }
 0x620   : > { %2809 = vmatprep.mubr.msk.f32.mxu1 %vm3804_vm12, %v2531_v29 }
 0x621   : > { %v1774_v23 = vrot.slane %v1773_v18, 1 }
 0x623   : > { %2810 = vmatmul.mubr.msk.f32.gmra.mxu1 %vm3805_vm13, %v2532_v30  ;;  %v1775_v26 = vadd.f32 %v1774_v23, %v1773_v18  ;;  %v2577_v18 = vld [vmem:[%s3797_s3 + $0xd8] sm:$0xff]  ;;  %v2580_v23 = vld [vmem:[%s3797_s3 + $0xf0] sm:$0xff] }
 0x6d7   : > { %v2802_v35 = vpop.f32.mrf.mxu1 }
 0x6d8   : > { %v1600_v62 = vsub.f32 %v2802_v35, %v1567_v31 }
 0x6d9   : > { %v1511_v36 = vpop.f32.mrf.mxu1 }
 0x6da   : > { %v1599_v56 = vsub.f32 %v1511_v36, %v1562_v32 }
 0x6db   : > { %v2805_v37 = vpop.f32.mrf.mxu1 }
 0x6dc   : > { %v1602_v0 = vsub.f32 %v2805_v37, %v1577_v33 }
 0x6dd   : > { %v1521_v39 = vpop.f32.mrf.mxu1 }
 0x6de   : > { %v1601_v2 = vsub.f32 %v1521_v39, %v1572_v34 }
 0x6df   : > { %v2808_v41 = vpop.f32.mrf.mxu1 }
 0x6e0   : > { %v1604_v57 = vsub.f32 %v2808_v41, %v1587_v38 }
 0x6e1   : > { %v1531_v42 = vpop.f32.mrf.mxu1 }
 0x6e2   : > { %v1603_v44 = vsub.f32 %v1531_v42, %v1582_v40  ;;  %v1608_v50 = vmax.f32 %v1600_v62, %v1604_v57 }
 0x6e3   : > { %v2811_v55 = vpop.f32.mrf.mxu1 }
 0x6e4   : > { %v1606_v58 = vsub.f32 %v2811_v55, %v1597_v45  ;;  %v1607_v3 = vmax.f32 %v1599_v56, %v1603_v44 }
 0x6e5   : > { %v1541_v63 = vpop.f32.mrf.mxu1 }
 0x6e6   : > { %v1605_v46 = vsub.f32 %v1541_v63, %v1592_v59  ;;  %v1610_v5 = vmax.f32 %v1602_v0, %v1606_v58  ;;  %v1611_v11 = vmax.f32 %v1607_v3, %v1608_v50  ;;  %v2240_v59 = vsel %vm2239_vm4, %v3388_v14, %v3490_v6  ;;  %v2557_v14 = vld [vmem:[%s3781_s5 + $0x10] sm:$0xff]  ;;  %v2569_v50 = vld [vmem:[%s3795_s1 + $0x38] sm:$0xff] }
 0x6e7   : > { %v2568_v6 = vld [vmem:[%s3795_s1 + $0x30] sm:$0xff]  ;;  %v1304_v63 = vadd.f32 %v3531_v8, %v3429_v20  ;;  %v2574_v20 = vld [vmem:[%s3797_s3 + $0xc0] sm:$0xff]  ;;  %v1791_v8 = vpop.permute.xlu1 %1790  ;;  %s2943_s1 = scalar_lea.vmem %s2942_s25, 128 }
 0x6e8   : > { %v1609_v7 = vmax.f32 %v1601_v2, %v1605_v46  ;;  %2833 = vmatprep.mubr.msk.f32.mxu1 %vm408_vm0, %v2568_v6  ;;  %p2945_p2 = scmp.lt.s32.totalorder %s2943_s1, %s2937_s0 }
 0x6ea   : > { %v1612_v22 = vmax.f32 %v1609_v7, %v1610_v5  ;;  %v1786_v7 = vpop.permute.xlu0 %1785  ;;  %p2946_p3 = por %p2945_p2, %p2944_p1 }
 0x6ec   : > { %v1613_v12 = vmax.f32 %v1611_v11, %v1612_v22  ;;  %v2575_v22 = vld [vmem:[%s3797_s3 + $0xc8] sm:$0xff]  ;;  %p2947_p5 = pnand %p2946_p3, %p2940_p0 }
 0x6ee   : > { %v1614_v16 = vrot.slane %v1613_v12, 4 }
 0x6f0   : > { %v1615_v17 = vmax.f32 %v1613_v12, %v1614_v16  ;;  %v2576_v16 = vld [vmem:[%s3797_s3 + $0xd0] sm:$0xff] }
 0x6f2   : > { %v1616_v19 = vrot.slane %v1615_v17, 2 }
 0x6f4   : > { %v1617_v21 = vmax.f32 %v1615_v17, %v1616_v19  ;;  %v2578_v19 = vld [vmem:[%s3797_s3 + $0xe0] sm:$0xff] }
 0x6f6   : > { %v1618_v4 = vrot.slane %v1617_v21, 1 }
 0x6f8   : > { %v1619_v24 = vmax.f32 %v1617_v21, %v1618_v4  ;;  %v2579_v21 = vld [vmem:[%s3797_s3 + $0xe8] sm:$0xff]  ;;  %v2581_v4 = vld [vmem:[%s3797_s3 + $0xf8] sm:$0xff] }
 0x6fa   : > { %vm1620_vm3 = vcmp.eq.f32.partialorder %v1599_v56, %v1619_v24  ;;  %vm1621_vm5 = vcmp.eq.f32.partialorder %v1600_v62, %v1619_v24  ;;  %vm1622_vm6 = vcmp.eq.f32.partialorder %v1601_v2, %v1619_v24  ;;  %vm1623_vm7 = vcmp.eq.f32.partialorder %v1602_v0, %v1619_v24 }
 0x6fb   : > { %vm1624_vm8 = vcmp.eq.f32.partialorder %v1603_v44, %v1619_v24  ;;  %vm1625_vm9 = vcmp.eq.f32.partialorder %v1604_v57, %v1619_v24  ;;  %vm1626_vm1 = vcmp.eq.f32.partialorder %v1605_v46, %v1619_v24  ;;  %vm1627_vm10 = vcmp.eq.f32.partialorder %v1606_v58, %v1619_v24 }
 0x6fc   : > { %v1628_v25 = vsel %vm1620_vm3, %v3343_v43, 64  ;;  %v1629_v27 = vsel %vm1621_vm5, %v3348_v47, 64  ;;  %v1630_v28 = vsel %vm1622_vm6, %v3351_v48, 64  ;;  %v1631_v29 = vsel %vm1623_vm7, %v3354_v49, 64 }
 0x6fd   : > { %v1632_v30 = vsel %vm1624_vm8, %v3359_v51, 64  ;;  %v1633_v31 = vsel %vm1625_vm9, %v3362_v52, 64  ;;  %v1634_v32 = vsel %vm1626_vm1, %v3365_v53, 64  ;;  %v1635_v33 = vsel %vm1627_vm10, %v3368_v54, 64 }
 0x6fe   : > { %vm1636_vm11 = vcmp.lt.s32.totalorder %v1628_v25, %v1632_v30  ;;  %vm1638_vm12 = vcmp.lt.s32.totalorder %v1629_v27, %v1633_v31  ;;  %vm1640_vm13 = vcmp.lt.s32.totalorder %v1630_v28, %v1634_v32  ;;  %vm1642_vm2 = vcmp.lt.s32.totalorder %v1631_v29, %v1635_v33 }
 0x6ff   : > { %v1637_v35 = vsel %vm1636_vm11, %v1628_v25, %v1632_v30  ;;  %v1639_v34 = vsel %vm1638_vm12, %v1629_v27, %v1633_v31  ;;  %v1641_v36 = vsel %vm1640_vm13, %v1630_v28, %v1634_v32  ;;  %v1643_v37 = vsel %vm1642_vm2, %v1631_v29, %v1635_v33 }
 0x700   : > { %vm1644_vm3 = vcmp.lt.s32.totalorder %v1637_v35, %v1639_v34  ;;  %vm1646_vm5 = vcmp.lt.s32.totalorder %v1641_v36, %v1643_v37  ;;  %v1776_v38 = vsub.f32 %v1775_v26, %v1619_v24  ;;  %v2029_v24 = vpop.permute.xlu0 %2028  ;;  %v2024_v26 = vpop.permute.xlu1 %2023 }
 0x701   : > { %v1645_v39 = vsel %vm1644_vm3, %v1637_v35, %v1639_v34  ;;  %v1647_v40 = vsel %vm1646_vm5, %v1641_v36, %v1643_v37  ;;  %vm3806_vm3 = vmmov 0   ;;  %vm3807_vm5 = vcmask 130048  }
 0x702   : > { %vm1648_vm6 = vcmp.lt.s32.totalorder %v1645_v39, %v1647_v40  ;;  %v3588_v41 = vsel %vm2241_vm14, %v3488_v60, %v1776_v38 }
 0x703   : > { %v1649_v42 = vsel %vm1648_vm6, %v1645_v39, %v1647_v40 }
 0x704   : > { %v1650_v44 = vrot.slane %v1649_v42, 4  ;;  %v2039_v25 = vpop.permute.xlu0 %2038  ;;  %v2034_v28 = vpop.permute.xlu1 %2033 }
 0x706   : > { %vm1651_vm7 = vcmp.lt.s32.totalorder %v1649_v42, %v1650_v44 }
 0x707   : > { %v1652_v45 = vsel %vm1651_vm7, %v1649_v42, %v1650_v44 }
 0x708   : > { %v1653_v55 = vrot.slane %v1652_v45, 2  ;;  %v2049_v31 = vpop.permute.xlu0 %2048  ;;  %v2044_v33 = vpop.permute.xlu1 %2043 }
 0x70a   : > { %vm1654_vm8 = vcmp.lt.s32.totalorder %v1652_v45, %v1653_v55 }
 0x70b   : > { %v1655_v56 = vsel %vm1654_vm8, %v1652_v45, %v1653_v55 }
 0x70c   : > { %v1656_v57 = vrot.slane %v1655_v56, 1  ;;  %v2059_v37 = vpop.permute.xlu0 %2058  ;;  %v2054_v44 = vpop.permute.xlu1 %2053 }
 0x70e   : > { %vm1657_vm9 = vcmp.lt.s32.totalorder %v1655_v56, %v1656_v57 }
 0x70f   : > { %v1658_v58 = vsel %vm1657_vm9, %v1655_v56, %v1656_v57 }
 0x710   : > { %vm1666_vm2 = vcmp.eq.s32.totalorder %v3368_v54, %v1658_v58  ;;  %vm1665_vm1 = vcmp.eq.s32.totalorder %v3365_v53, %v1658_v58  ;;  %v3598_v60 = vsel %vm2241_vm14, %v2240_v59, %v1658_v58  ;;  %vm1664_vm10 = vcmp.eq.s32.totalorder %v3362_v52, %v1658_v58 }
 0x711   : > { %2813 = vmatpush3.msk.msra.mxu0 %vm1666_vm2, %v3048_v15  ;;  %vm1663_vm11 = vcmp.eq.s32.totalorder %v3359_v51, %v1658_v58  ;;  %vm1662_vm4 = vcmp.eq.s32.totalorder %v3354_v49, %v1658_v58  ;;  %vm1661_vm14 = vcmp.eq.s32.totalorder %v3351_v48, %v1658_v58  ;;  %vm1660_vm12 = vcmp.eq.s32.totalorder %v3348_v47, %v1658_v58 }
 0x712   : > { %2814 = vmatprep.subr.mxu0 %v3046_v1  ;;  %vm1659_vm13 = vcmp.eq.s32.totalorder %v3343_v43, %v1658_v58 }
 0x713   : > { %2815 = vmatpush3.msk.msra.mxu0 %vm1665_vm1, %v3048_v15 }
 0x714   : > { %2816 = vmatprep.subr.mxu0 %v3046_v1 }
 0x715   : > { %2817 = vmatpush3.msk.msra.mxu0 %vm1664_vm10, %v3048_v15  ;;  %vm2243_vm10 = vcmask 1042432  }
 0x716   : > { %2818 = vmatprep.subr.mxu0 %v3046_v1 }
 0x717   : > { %2819 = vmatpush3.msk.msra.mxu0 %vm1663_vm11, %v3048_v15 }
 0x718   : > { %2820 = vmatprep.subr.mxu0 %v3046_v1 }
 0x719   : > { %2821 = vmatpush3.msk.msra.mxu0 %vm1662_vm4, %v3048_v15 }
 0x71a   : > { %2822 = vmatprep.subr.mxu0 %v3046_v1 }
 0x71b   : > { %2823 = vmatpush3.msk.msra.mxu0 %vm1661_vm14, %v3048_v15 }
 0x71c   : > { %2824 = vmatprep.subr.mxu0 %v3046_v1 }
 0x71d   : > { %2825 = vmatpush3.msk.msra.mxu0 %vm1660_vm12, %v3048_v15 }
 0x71e   : > { %2826 = vmatprep.subr.mxu0 %v3046_v1 }
 0x71f   : > { %2827 = vmatpush3.msk.msra.mxu0 %vm1659_vm13, %v3048_v15 }
 0x720   : > { %2829 = vmatmul.mubr.msk.f32.vlgmr.msra.gmra.mxu0 %vm767_vm15, %v2557_v14 }
 0x721   : > { %2840 = vmatprep.mubr.msk.f32.mxu0 %vm3807_vm5, %v2574_v20 }
 0x7e0   : > { %v1761_v62 = vpop.f32.mrf.mxu0 }
 0x7e1   : > { %v1762_v0 = vadd.f32 %v1761_v62, %v1690_v61 }
 0x7e2   : > { %v2830_v2 = vpop.f32.mrf.mxu0 }
 0x7e3   : > { %v1765_v3 = vsub.f32 %v3535_v10, %v1762_v0  ;;  %v3630_v46 = vadd.f32 %v1762_v0, %v1304_v63 }
 0x7e5   : > { %2831 = vmatprep.subr.mxu1 %v1765_v3 }
 0x7e6   : > { %2832 = vmatpush3.msra.mxu1 %v1765_v3 }
 0x7e7   : > { %2834 = vmatmul.mubr.msk.f32.vlgmr.msra.gmra.mxu1 %vm408_vm0, %v2569_v50  ;;  %2852 = vmatprep.subr.mxu1 %v3046_v1  ;;  %vm3808_vm0 = vmmov %vm3807_vm5 }
 0x7e8   : > { %2868 = vmatprep.mubr.msk.f32.mxu1 %vm3806_vm3, %v3046_v1  ;;  %vm3809_vm6 = vmmov %vm3808_vm0 }
 0x7e9   : > { %vm3810_vm7 = vmmov %vm3808_vm0 }
 0x7ea   : > { %vm3811_vm8 = vmmov %vm3808_vm0 }
 0x7eb   : > { %vm3812_vm9 = vmmov %vm3808_vm0 }
 0x7ec   : > { %vm3813_vm2 = vmmov %vm3808_vm0 }
 0x7ed   : > { %vm3814_vm1 = vmmov %vm3808_vm0 }
 0x8a7   : > { %v2835_v10 = vpop.f32.mrf.mxu1 }
 0x8a8   : > { %v1871_v5 = vadd.f32 %v2835_v10, %v1791_v8 }
 0x8a9   : > { %v1865_v9 = vpop.f32.mrf.mxu1 }
 0x8aa   : > { %v1866_v11 = vadd.f32 %v1865_v9, %v1786_v7  ;;  %2836 = vmatprep.subr.mxu0 %v1871_v5  ;;  %v2229_v12 = vmul.f32 %v1871_v5, %v1871_v5 }
 0x8ab   : > { %2837 = vmatpush3.msra.mxu0 %v1871_v5 }
 0x8ac   : > { %v2228_v13 = vmul.f32 %v1866_v11, %v1866_v11  ;;  %2838 = vmatprep.subr.mxu0 %v1866_v11 }
 0x8ad   : > { %2839 = vmatpush3.msra.mxu0 %v1866_v11 }
 0x8ae   : > { %v2230_v17 = vadd.f32 %v2229_v12, %v2228_v13  ;;  %2841 = vmatmul.mubr.msk.f32.vlgmr.msra.gmra.mxu0 %vm3808_vm0, %v2575_v22 }
 0x8af   : > { %2843 = vmatprep.mubr.msk.f32.mxu0 %vm3809_vm6, %v2576_v16 }
 0x8b0   : > { %v2231_v45 = vrot.slane %v2230_v17, 4 }
 0x8b2   : > { %2844 = vmatmul.mubr.msk.f32.gmra.mxu0 %vm3810_vm7, %v2577_v18  ;;  %v2232_v63 = vadd.f32 %v2231_v45, %v2230_v17 }
 0x8b3   : > { %2846 = vmatprep.mubr.msk.f32.mxu0 %vm3811_vm8, %v2578_v19 }
 0x8b4   : > { %v2233_v50 = vrot.slane %v2232_v63, 2 }
 0x8b6   : > { %2847 = vmatmul.mubr.msk.f32.gmra.mxu0 %vm3812_vm9, %v2579_v21  ;;  %v2234_v10 = vadd.f32 %v2233_v50, %v2232_v63 }
 0x8b7   : > { %2849 = vmatprep.mubr.msk.f32.mxu0 %vm3813_vm2, %v2580_v23 }
 0x8b8   : > { %v2235_v9 = vrot.slane %v2234_v10, 1 }
 0x8ba   : > { %2850 = vmatmul.mubr.msk.f32.gmra.mxu0 %vm3814_vm1, %v2581_v4  ;;  %v2236_v12 = vadd.f32 %v2235_v9, %v2234_v10 }
 0x96e   : > { %v2842_v27 = vpop.f32.mrf.mxu0 }
 0x96f   : > { %v2062_v55 = vsub.f32 %v2842_v27, %v2029_v24 }
 0x970   : > { %v1973_v29 = vpop.f32.mrf.mxu0 }
 0x971   : > { %v2061_v39 = vsub.f32 %v1973_v29, %v2024_v26 }
 0x972   : > { %v2845_v30 = vpop.f32.mrf.mxu0 }
 0x973   : > { %v2064_v57 = vsub.f32 %v2845_v30, %v2039_v25 }
 0x974   : > { %v1983_v32 = vpop.f32.mrf.mxu0 }
 0x975   : > { %v2063_v58 = vsub.f32 %v1983_v32, %v2034_v28 }
 0x976   : > { %v2848_v35 = vpop.f32.mrf.mxu0 }
 0x977   : > { %v2066_v40 = vsub.f32 %v2848_v35, %v2049_v31 }
 0x978   : > { %v1993_v34 = vpop.f32.mrf.mxu0 }
 0x979   : > { %v2065_v36 = vsub.f32 %v1993_v34, %v2044_v33  ;;  %v2070_v6 = vmax.f32 %v2062_v55, %v2066_v40 }
 0x97a   : > { %v2851_v38 = vpop.f32.mrf.mxu0 }
 0x97b   : > { %v2068_v42 = vsub.f32 %v2851_v38, %v2059_v37  ;;  %v2069_v59 = vmax.f32 %v2061_v39, %v2065_v36 }
 0x97c   : > { %v2003_v56 = vpop.f32.mrf.mxu0 }
 0x97d   : > { %v2067_v14 = vsub.f32 %v2003_v56, %v2054_v44  ;;  %v2072_v61 = vmax.f32 %v2064_v57, %v2068_v42  ;;  %v2073_v0 = vmax.f32 %v2069_v59, %v2070_v6 }
 0x97f   : > { %v2071_v62 = vmax.f32 %v2063_v58, %v2067_v14 }
 0x981   : > { %v2074_v2 = vmax.f32 %v2071_v62, %v2072_v61 }
 0x983   : > { %v2075_v3 = vmax.f32 %v2073_v0, %v2074_v2 }
 0x985   : > { %v2076_v20 = vrot.slane %v2075_v3, 4 }
 0x987   : > { %v2077_v8 = vmax.f32 %v2075_v3, %v2076_v20 }
 0x989   : > { %v2078_v5 = vrot.slane %v2077_v8, 2 }
 0x98b   : > { %v2079_v7 = vmax.f32 %v2077_v8, %v2078_v5 }
 0x98d   : > { %v2080_v11 = vrot.slane %v2079_v7, 1 }
 0x98f   : > { %v2081_v22 = vmax.f32 %v2079_v7, %v2080_v11 }
 0x991   : > { %vm2082_vm11 = vcmp.eq.f32.partialorder %v2061_v39, %v2081_v22  ;;  %vm2083_vm4 = vcmp.eq.f32.partialorder %v2062_v55, %v2081_v22  ;;  %vm2084_vm14 = vcmp.eq.f32.partialorder %v2063_v58, %v2081_v22  ;;  %vm2085_vm12 = vcmp.eq.f32.partialorder %v2064_v57, %v2081_v22 }
 0x992   : > { %vm2086_vm13 = vcmp.eq.f32.partialorder %v2065_v36, %v2081_v22  ;;  %vm2087_vm3 = vcmp.eq.f32.partialorder %v2066_v40, %v2081_v22  ;;  %vm2088_vm5 = vcmp.eq.f32.partialorder %v2067_v14, %v2081_v22  ;;  %vm2089_vm0 = vcmp.eq.f32.partialorder %v2068_v42, %v2081_v22 }
 0x993   : > { %v2090_v13 = vsel %vm2082_vm11, %v3343_v43, 64  ;;  %v2091_v16 = vsel %vm2083_vm4, %v3348_v47, 64  ;;  %v2092_v17 = vsel %vm2084_vm14, %v3351_v48, 64  ;;  %v2093_v18 = vsel %vm2085_vm12, %v3354_v49, 64 }
 0x994   : > { %v2094_v19 = vsel %vm2086_vm13, %v3359_v51, 64  ;;  %v2095_v21 = vsel %vm2087_vm3, %v3362_v52, 64  ;;  %v2096_v23 = vsel %vm2088_vm5, %v3365_v53, 64  ;;  %v2097_v4 = vsel %vm2089_vm0, %v3368_v54, 64 }
 0x995   : > { %vm2098_vm6 = vcmp.lt.s32.totalorder %v2090_v13, %v2094_v19  ;;  %vm2100_vm7 = vcmp.lt.s32.totalorder %v2091_v16, %v2095_v21  ;;  %vm2102_vm8 = vcmp.lt.s32.totalorder %v2092_v17, %v2096_v23  ;;  %vm2104_vm9 = vcmp.lt.s32.totalorder %v2093_v18, %v2097_v4 }
 0x996   : > { %v2099_v24 = vsel %vm2098_vm6, %v2090_v13, %v2094_v19  ;;  %v2101_v26 = vsel %vm2100_vm7, %v2091_v16, %v2095_v21  ;;  %v2103_v25 = vsel %vm2102_vm8, %v2092_v17, %v2096_v23  ;;  %v2105_v27 = vsel %vm2104_vm9, %v2093_v18, %v2097_v4 }
 0x997   : > { %vm2106_vm2 = vcmp.lt.s32.totalorder %v2099_v24, %v2101_v26  ;;  %vm2108_vm1 = vcmp.lt.s32.totalorder %v2103_v25, %v2105_v27  ;;  %v2237_v28 = vsub.f32 %v2236_v12, %v2081_v22  ;;  %vm2249_vm11 = vcmask 1043456  }
 0x998   : > { %v2107_v29 = vsel %vm2106_vm2, %v2099_v24, %v2101_v26  ;;  %v2109_v30 = vsel %vm2108_vm1, %v2103_v25, %v2105_v27 }
 0x999   : > { %vm2110_vm4 = vcmp.lt.s32.totalorder %v2107_v29, %v2109_v30  ;;  %v2248_v31 = vsel %vm2243_vm10, %v3588_v41, %v2237_v28 }
 0x99a   : > { %v2111_v32 = vsel %vm2110_vm4, %v2107_v29, %v2109_v30  ;;  %v2250_v33 = vsel %vm2249_vm11, %v2248_v31, 0.0 }
 0x99b   : > { %v2112_v35 = vrot.slane %v2111_v32, 4  ;;  %2251 = vadd.xlane.f32.xlu1 %v2250_v33 }
 0x99d   : > { %vm2113_vm14 = vcmp.lt.s32.totalorder %v2111_v32, %v2112_v35 }
 0x99e   : > { %v2114_v34 = vsel %vm2113_vm14, %v2111_v32, %v2112_v35 }
 0x99f   : > { %v2115_v36 = vrot.slane %v2114_v34, 2 }
 0x9a1   : > { %vm2116_vm12 = vcmp.lt.s32.totalorder %v2114_v34, %v2115_v36 }
 0x9a2   : > { %v2117_v37 = vsel %vm2116_vm12, %v2114_v34, %v2115_v36 }
 0x9a3   : > { %v2118_v38 = vrot.slane %v2117_v37, 1 }
 0x9a5   : > { %vm2119_vm13 = vcmp.lt.s32.totalorder %v2117_v37, %v2118_v38 }
 0x9a6   : > { %v2120_v39 = vsel %vm2119_vm13, %v2117_v37, %v2118_v38 }
 0x9a7   : > { %vm2128_vm3 = vcmp.eq.s32.totalorder %v3368_v54, %v2120_v39  ;;  %vm2127_vm5 = vcmp.eq.s32.totalorder %v3365_v53, %v2120_v39  ;;  %v2244_v41 = vsel %vm2243_vm10, %v3598_v60, %v2120_v39  ;;  %vm2126_vm0 = vcmp.eq.s32.totalorder %v3362_v52, %v2120_v39 }
 0x9a8   : > { %2853 = vmatpush3.msk.msra.mxu1 %vm2128_vm3, %v3048_v15  ;;  %2245 = vst [vmem:[%s360_s23] sm:$0xf] %v2244_v41  ;;  %vm2125_vm6 = vcmp.eq.s32.totalorder %v3359_v51, %v2120_v39  ;;  %vm2124_vm10 = vcmp.eq.s32.totalorder %v3354_v49, %v2120_v39  ;;  %vm2123_vm7 = vcmp.eq.s32.totalorder %v3351_v48, %v2120_v39  ;;  %v2606_v49 = vld [vmem:[%s3781_s5 + $0x18] sm:$0xff] }
 0x9a9   : > { %2854 = vmatprep.subr.mxu1 %v3046_v1  ;;  %vm2122_vm8 = vcmp.eq.s32.totalorder %v3348_v47, %v2120_v39  ;;  %vm2121_vm9 = vcmp.eq.s32.totalorder %v3343_v43, %v2120_v39 }
 0x9aa   : > { %2855 = vmatpush3.msk.msra.mxu1 %vm2127_vm5, %v3048_v15 }
 0x9ab   : > { %2856 = vmatprep.subr.mxu1 %v3046_v1 }
 0x9ac   : > { %2857 = vmatpush3.msk.msra.mxu1 %vm2126_vm0, %v3048_v15 }
 0x9ad   : > { %2858 = vmatprep.subr.mxu1 %v3046_v1 }
 0x9ae   : > { %2859 = vmatpush3.msk.msra.mxu1 %vm2125_vm6, %v3048_v15 }
 0x9af   : > { %2860 = vmatprep.subr.mxu1 %v3046_v1 }
 0x9b0   : > { %2861 = vmatpush3.msk.msra.mxu1 %vm2124_vm10, %v3048_v15 }
 0x9b1   : > { %2862 = vmatprep.subr.mxu1 %v3046_v1 }
 0x9b2   : > { %2863 = vmatpush3.msk.msra.mxu1 %vm2123_vm7, %v3048_v15 }
 0x9b3   : > { %2864 = vmatprep.subr.mxu1 %v3046_v1 }
 0x9b4   : > { %2865 = vmatpush3.msk.msra.mxu1 %vm2122_vm8, %v3048_v15 }
 0x9b5   : > { %2866 = vmatprep.subr.mxu1 %v3046_v1 }
 0x9b6   : > { %2867 = vmatpush3.msk.msra.mxu1 %vm2121_vm9, %v3048_v15 }
 0x9b7   : > { %2869 = vmatmul.mubr.msk.f32.vlgmr.msra.gmra.mxu1 %vm767_vm15, %v2606_v49 }
 0x9b8   : > { %2950 = shalt.err (!%p2947_p5)
}
 0x9b9   : > { %s2951_s23 = scalar_lea.hbm %s2294_s16, 64  ;;  %s2955_s15 = scalar_lea.hbm %s3784_s8, 128 }
 0x9ba   : > { %p2952_p6 = scmp.ne.s32.totalorder %s2294_s16, %s2951_s23  ;;  %p2956_p10 = scmp.lt.s32.totalorder %s2294_s16, %s3784_s8 }
 0x9bb   : > { %p2957_p11 = scmp.lt.s32.totalorder %s2955_s15, %s2951_s23 }
 0x9bc   : > { %p2953_p7 = pnand %p2952_p6, %p3141_p4 }
 0x9bd   : > { %p2958_p12 = por %p2957_p11, %p2956_p10 }
 0x9be   : > { %p2954_p9 = pneg %p2953_p7 }
 0x9c0   : > { %p2959_p13 = pnand %p2958_p12, %p2954_p9 }
 0x9c2   : > { %2962 = shalt.err (!%p2959_p13)
}
 0x9c3   : > { %2872 = dma.vmem_to_hbm [thread:$0]  (%p3141_p4), %s2297_s28, 64, %s2294_s16, %s2261_s20   ;;  %vm2253_vm15 = vcmask 3072   ;;  %v2152_v43 = vpop.permute.xlu0 %2151 }
 0x9c4   : > { %s2442_s0 = sshll.u32 %s3165_s27, 2  ;;  %s2439_s2 = sshll.u32 %s3682_s18, 3 }
 0x9c5   : > { %s383_s25 = scalar_lea.vmem %s3785_s9, %s2442_s0  ;;  %s2619_s3 = sshll.u32 %s3035_s12, 7 }
 0x9c6   : > { %s353_s23 = scalar_lea.vmem [#allocation2], %s2439_s2  ;;  %s2280_s16 = scalar_lea.hbm %s3783_s7, %s2619_s3 }
 0x9c7   : > { %s2282_s26 = sshll.u32 %s353_s23, 4  ;;  %s2256_s20 = scalar_lea.sflag [#allocation3], %s3682_s18  ;;  %s2283_s26 = int_to_ptr.vmem [resolvable:$true] %s2282_s26 }
 0x9c8   : > { %s2963_s29 = scalar_lea.vmem %s2283_s26, 128  ;;  %s3050_s15 = smov [#allocation2]  }
 0x9c9   : > { %p2964_p0 = scmp.ne.s32.totalorder %s2283_s26, %s2963_s29  ;;  %s2967_s12 = sshll.u32 %s3050_s15, 4  ;;  %s2968_s12 = int_to_ptr.vmem [resolvable:$false] %s2967_s12 }
 0x9ca   : > { %s2969_s0 = scalar_lea.vmem %s2968_s12, 256  ;;  %p2970_p3 = scmp.lt.s32.totalorder %s2283_s26, %s2968_s12 }
 0x9cb   : > { %p2965_p1 = pnand %p2964_p0, %p3141_p4  ;;  %p2971_p5 = scmp.lt.s32.totalorder %s2969_s0, %s2963_s29 }
 0x9cd   : > { %p2966_p2 = pneg %p2965_p1  ;;  %p2972_p6 = por %p2971_p5, %p2970_p3 }
 0x9cf   : > { %p2973_p7 = pnand %p2972_p6, %p2966_p2 }
 0xa24   : > { %v2252_v1 = vpop.xlane.xlu1 %2251 }
 0xa25   : > { %2254 = vst.msk [vmem:[%s383_s25] sm:$0xf] %vm2253_vm15, %v2252_v1 }
 0xa77   : > { %v2223_v47 = vpop.f32.mrf.mxu1 }
 0xa78   : > { %v2224_v48 = vadd.f32 %v2223_v47, %v2152_v43 }
 0xa79   : > { %v2870_v51 = vpop.f32.mrf.mxu1 }
 0xa7a   : > { %v2227_v52 = vadd.f32 %v2224_v48, %v3630_v46 }
 0xa7c   : > { %2238 = vst [vmem:[%s353_s23] sm:$0xff] %v2227_v52 }
 0xa7d   : > { %2976 = shalt.err (!%p2973_p7)
}
 0xa7e   : > { %s2977_s1 = scalar_lea.hbm %s2280_s16, 128  ;;  %s2981_s25 = scalar_lea.hbm %s3783_s7, 256 }
 0xa7f   : > { %p2978_p9 = scmp.ne.s32.totalorder %s2280_s16, %s2977_s1  ;;  %p2982_p12 = scmp.lt.s32.totalorder %s2280_s16, %s3783_s7 }
 0xa80   : > { %p2983_p13 = scmp.lt.s32.totalorder %s2981_s25, %s2977_s1 }
 0xa81   : > { %p2979_p10 = pnand %p2978_p9, %p3141_p4 }
 0xa82   : > { %p2984_p0 = por %p2983_p13, %p2982_p12 }
 0xa83   : > { %p2980_p11 = pneg %p2979_p10 }
 0xa85   : > { %p2985_p1 = pnand %p2984_p0, %p2980_p11 }
 0xa87   : > { %2988 = shalt.err (!%p2985_p1)
}
 0xa88   : > { %2871 = dma.vmem_to_hbm [thread:$0]  (%p3141_p4), %s2283_s26, 128, %s2280_s16, %s2256_s20  }
 0xa89 PF: > { %p2882_p2 = scmp.ge.s32.totalorder %s3043_s14, 2  ;;  %s2311_s23 = sand.u32 1, %s3023_s30  }
 0xa8a   : > { %s2312_s27 = scalar_lea.sflag [#allocation3], %s2311_s23 }
 0xa8b   : > { %p2876_p3 = pnand %p2882_p2, %p3148_p8 }
 0xa8d   : > { %p2877_p5 = pneg %p2876_p3 }
 0xa8f   : > { %3014 = dma.done.wait (%p2877_p5), %s2312_s27, 128  }
 0xa90   : > { %3016 = vsyncadd (%p2877_p5), %s2312_s27, 4294967168  ;;  %s2321_s28 = scalar_lea.sflag [#allocation5], %s2311_s23 }
 0xa91   : > { %3018 = dma.done.wait (%p2877_p5), %s2321_s28, 64  }
 0xa92   : > { %3020 = vsyncadd (%p2877_p5), %s2321_s28, 4294967232  ;;  %s26_s14 = sadd.s32 1, %s3043_s14   ;;  %s3815_s30 = smov %s3027_s10 }
 0xa93   : > { %p23_p6 = scmp.ge.s32.totalorder %s26_s14, 4   ;;  %s3816_s10 = smov %s3031_s11 }
 0xa94   : > { %s3817_s11 = smov %s3154_s22  ;;  %s3818_s12 = smov %s3039_s13 }
 0xa95   : > { %s3819_s13 = smov %s3821_s17  ;;  %25 = sbr.rel (!%p23_p6) target bundleno = 11 (0xb), region = 130 }
 0xa9a   :  { %2336 = vsyncpa [#allocation3], 1 }
 0xa9b   :  { %2338 = vsyncpa [#allocation3 + $0x1], 1 }
 0xa9c   :  { %2339 = vsyncpa [#allocation5], 1 }
 0xa9d   :  { %2341 = vsyncpa [#allocation5 + $0x1], 1 }

</bundles_post_ra>
